<compile_context>
chip_gen: v6e
topology: v6e:2x2x1
jax: 0.10.0
libtpu: 0.0.40
codegen_flags: <defaults>
</compile_context>

<pallas_src>
import math
import functools

import jax
import jax.numpy as jnp
from jax.experimental import pallas as pl
from jax.experimental.pallas import tpu as pltpu


COMPUTE_DTYPE = jnp.bfloat16          # MXU input dtype (f32 accumulation everywhere)


# --------------------------------------------------------------------------
# generation-aware defaults
# --------------------------------------------------------------------------

def _chip_defaults():
    kind = ""
    try:
        kind = jax.devices()[0].device_kind.lower()
    except Exception:
        pass
    if "v6" in kind:       # v6e: 128 MiB VMEM, 256-wide MXU
        return dict(vmem_bytes=100 * 1024 * 1024, tm=512, tq=256, tk=256,
                    ti=1024, tn=512)
    if "v5" in kind:       # v5e/v5p: keep 128-wide tiles, modest VMEM budget
        return dict(vmem_bytes=64 * 1024 * 1024, tm=256, tq=128, tk=128,
                    ti=512, tn=512)
    if "v7" in kind:       # v7x: only 64 MiB VMEM per TensorCore
        return dict(vmem_bytes=52 * 1024 * 1024, tm=256, tq=256, tk=256,
                    ti=256, tn=256)
    return dict(vmem_bytes=48 * 1024 * 1024, tm=256, tq=128, tk=128,
                ti=512, tn=512)


def _cparams(dim_sem, vmem_bytes):
    return pltpu.CompilerParams(dimension_semantics=dim_sem,
                                vmem_limit_bytes=vmem_bytes)


# --------------------------------------------------------------------------
# tile-size helpers (aligned tiles; pad rows instead of unaligned fallbacks)
# --------------------------------------------------------------------------

def _row_tile(m, target):
    """Sublane (second-minor) tile for a row dim. Returns (tile, padded_dim)."""
    if m <= target:
        return m, m                      # full-extent block is always legal
    for t in range(target - target % 128, 127, -128):
        if m % t == 0:
            return t, m
    for t in range(target - target % 8, 7, -8):
        if m % t == 0:
            return t, m
    tile = target - target % 8 if target >= 8 else 8
    padded = ((m + tile - 1) // tile) * tile
    return tile, padded                  # pad rows up to an aligned multiple


def _lane_tile(n, target):
    """Lane (minor) tile: multiple of 128 or full extent."""
    if n <= target:
        return n
    for t in range(target - target % 128, 127, -128):
        if n % t == 0:
            return t
    return n


def _seq_tile(s, target):
    """Sequence tile (second-minor in attention blocks)."""
    if s <= target:
        return s
    for t in range(target - target % 128, 127, -128):
        if s % t == 0:
            return t
    for t in range(target - target % 8, 7, -8):
        if s % t == 0:
            return t
    return s


def _pad_rows(x, m_pad):
    if x.shape[0] == m_pad:
        return x
    return jnp.pad(x, ((0, m_pad - x.shape[0]), (0, 0)))


# --------------------------------------------------------------------------
# Kernel A: fused RMSNorm + concatenated QKV matmul + RoPE (+ q pre-scale)
# --------------------------------------------------------------------------

def _rms_qkv_rope_kernel(x_ref, lnw_ref, wqkv_ref, cos_ref, sin_ref,
                         q_ref, k_ref, v_ref, *, eps, n_heads, n_kv_heads,
                         head_dim, q_scale):
    x = x_ref[...].astype(jnp.float32)
    var = jnp.mean(x * x, axis=-1, keepdims=True)
    xn = (x * jax.lax.rsqrt(var + eps) *
          lnw_ref[...].astype(jnp.float32)).astype(wqkv_ref.dtype)

    # single wide matmul over the concatenated [Wq | Wk | Wv] weight
    qkv = jnp.dot(xn, wqkv_ref[...], preferred_element_type=jnp.float32)

    nq = n_heads * head_dim
    nk = n_kv_heads * head_dim
    cos = cos_ref[...]                    # (tm, head_dim) f32, per-token
    sin = sin_ref[...]
    half = head_dim // 2

    def rope(t, n, scale):
        # per-head rotate_half + cos/sin modulation; once per token (hoisted
        # out of the attention inner loop).
        outs = []
        for h in range(n):
            th = t[:, h * head_dim:(h + 1) * head_dim]
            rot = jnp.concatenate([-th[:, half:], th[:, :half]], axis=-1)
            outs.append((th * cos + rot * sin) * scale)
        return jnp.concatenate(outs, axis=-1)

    q_ref[...] = rope(qkv[:, :nq], n_heads, q_scale).astype(q_ref.dtype)
    k_ref[...] = rope(qkv[:, nq:nq + nk], n_kv_heads, 1.0).astype(k_ref.dtype)
    v_ref[...] = qkv[:, nq + nk:].astype(v_ref.dtype)


def rms_qkv_rope(x2d, ln_w, wqkv, cos_m, sin_m, eps, *, n_heads, n_kv_heads,
                 head_dim, tm_target, vmem_bytes):
    M, H = x2d.shape
    Nq = n_heads * head_dim
    Nk = n_kv_heads * head_dim
    Ntot = wqkv.shape[1]
    tm, m_pad = _row_tile(M, tm_target)
    x_p = _pad_rows(x2d, m_pad)
    cos_p = _pad_rows(cos_m, m_pad)
    sin_p = _pad_rows(sin_m, m_pad)
    cost = pl.CostEstimate(
        flops=int(2 * m_pad * H * Ntot + 6 * m_pad * (Nq + Nk)),
        transcendentals=int(m_pad),
        bytes_accessed=int(4 * m_pad * H + 2 * H * Ntot + 2 * m_pad * Ntot))
    # TODO(synk): at real hidden sizes (H~4096) the wqkv weight should get an
    # extra N-tile grid axis instead of a single full block (v7x 64 MiB VMEM).
    q, k, v = pl.pallas_call(
        functools.partial(_rms_qkv_rope_kernel, eps=eps, n_heads=n_heads,
                          n_kv_heads=n_kv_heads, head_dim=head_dim,
                          q_scale=1.0 / math.sqrt(head_dim)),
        grid=(m_pad // tm,),
        in_specs=[pl.BlockSpec((tm, H), lambda i: (i, 0)),
                  pl.BlockSpec((1, H), lambda i: (0, 0)),
                  pl.BlockSpec((H, Ntot), lambda i: (0, 0)),
                  pl.BlockSpec((tm, head_dim), lambda i: (i, 0)),
                  pl.BlockSpec((tm, head_dim), lambda i: (i, 0))],
        out_specs=[pl.BlockSpec((tm, Nq), lambda i: (i, 0)),
                   pl.BlockSpec((tm, Nk), lambda i: (i, 0)),
                   pl.BlockSpec((tm, Nk), lambda i: (i, 0))],
        out_shape=[jax.ShapeDtypeStruct((m_pad, Nq), COMPUTE_DTYPE),
                   jax.ShapeDtypeStruct((m_pad, Nk), COMPUTE_DTYPE),
                   jax.ShapeDtypeStruct((m_pad, Nk), COMPUTE_DTYPE)],
        compiler_params=_cparams(("parallel",), vmem_bytes),
        cost_estimate=cost,
    )(x_p, ln_w.reshape(1, H), wqkv, cos_p, sin_p)
    if m_pad != M:
        q, k, v = q[:M], k[:M], v[:M]
    return q, k, v


# --------------------------------------------------------------------------
# Kernel B: flash attention (online softmax), GQA-grouped K/V reuse
#   grid = (B*nKV, S//tq, S//tk); one K/V tile serves all n_rep query heads.
#   Q/K are already RoPE'd and Q is pre-scaled by 1/sqrt(D) (Kernel A).
# --------------------------------------------------------------------------

def _flash_attn_kernel(q_ref, k_ref, v_ref, o_ref, m_scr, l_scr, acc_scr, *, n_rep):
    ki = pl.program_id(2)

    @pl.when(ki == 0)
    def _init():
        m_scr[...] = jnp.full(m_scr.shape, -jnp.inf, dtype=jnp.float32)
        l_scr[...] = jnp.zeros(l_scr.shape, dtype=jnp.float32)
        acc_scr[...] = jnp.zeros(acc_scr.shape, dtype=jnp.float32)

    k = k_ref[0]                                   # (tk, D) bf16
    v = v_ref[0]                                   # (tk, D) bf16

    # No mask: reference forward is called with attention_mask=None (the
    # PyTorch module only applies a mask when one is provided).
    for r in range(n_rep):                         # static unroll over GQA group
        q_r = q_ref[0, r]                          # (tq, D) bf16 (RoPE'd, scaled)
        s = jax.lax.dot_general(q_r, k, (((1,), (1,)), ((), ())),
                                preferred_element_type=jnp.float32)   # (tq, tk)
        m_prev = m_scr[r]
        m_new = jnp.maximum(m_prev, jnp.max(s, axis=-1, keepdims=True))
        alpha = jnp.exp(m_prev - m_new)
        p = jnp.exp(s - m_new)                     # s not used past this point
        l_scr[r] = alpha * l_scr[r] + jnp.sum(p, axis=-1, keepdims=True)
        acc_scr[r] = alpha * acc_scr[r] + jnp.dot(
            p.astype(v.dtype), v, preferred_element_type=jnp.float32)
        m_scr[r] = m_new

    @pl.when(ki == pl.num_programs(2) - 1)
    def _finalize():
        o_ref[0] = (acc_scr[...] *
                    pl.reciprocal(l_scr[...], approx=True)).astype(o_ref.dtype)


def flash_attention(q, k, v, *, n_rep, tq_target, tk_target, vmem_bytes):
    BG, n_rep_, S, D = q.shape            # BG = B * num_kv_heads
    assert n_rep_ == n_rep
    tq = _seq_tile(S, tq_target)
    tk = _seq_tile(S, tk_target)
    cost = pl.CostEstimate(
        flops=int(4 * BG * n_rep * S * S * D),
        transcendentals=int(BG * n_rep * S * S),
        bytes_accessed=int(2 * (2 * BG * n_rep * S * D) +
                           (S // tq) * 2 * 2 * BG * S * D))
    return pl.pallas_call(
        functools.partial(_flash_attn_kernel, n_rep=n_rep),
        grid=(BG, S // tq, S // tk),
        in_specs=[
            # all n_rep query heads of the group share this K/V tile
            pl.BlockSpec((1, n_rep, tq, D), lambda bg, qi, ki: (bg, 0, qi, 0)),
            pl.BlockSpec((1, tk, D), lambda bg, qi, ki: (bg, ki, 0)),
            pl.BlockSpec((1, tk, D), lambda bg, qi, ki: (bg, ki, 0)),
        ],
        out_specs=pl.BlockSpec((1, n_rep, tq, D), lambda bg, qi, ki: (bg, 0, qi, 0)),
        out_shape=jax.ShapeDtypeStruct((BG, n_rep, S, D), COMPUTE_DTYPE),
        scratch_shapes=[pltpu.VMEM((n_rep, tq, 1), jnp.float32),   # running max
                        pltpu.VMEM((n_rep, tq, 1), jnp.float32),   # running denom
                        pltpu.VMEM((n_rep, tq, D), jnp.float32)],  # output acc
        compiler_params=_cparams(("parallel", "parallel", "arbitrary"),
                                 vmem_bytes),
        cost_estimate=cost,
    )(q, k, v)


# --------------------------------------------------------------------------
# Kernel C: o_proj (contraction-tiled, f32 accumulator) + residual add
#   residual is aliased to the output (no fresh HBM buffer).
# --------------------------------------------------------------------------

def _o_proj_residual_kernel(attn_ref, wo_ref, res_ref, o_ref, acc_ref):
    j = pl.program_id(1)

    @pl.when(j == 0)
    def _init():
        acc_ref[...] = jnp.zeros_like(acc_ref)

    acc_ref[...] += jnp.dot(attn_ref[...], wo_ref[...],
                            preferred_element_type=jnp.float32)

    @pl.when(j == pl.num_programs(1) - 1)
    def _finalize():
        o_ref[...] = (res_ref[...].astype(jnp.float32) +
                      acc_ref[...]).astype(o_ref.dtype)


def o_proj_residual(attn2d, wo, residual2d, *, tm_target, tn_target, vmem_bytes):
    M, N = attn2d.shape
    H = wo.shape[1]
    tm, m_pad = _row_tile(M, tm_target)
    tn = _lane_tile(N, tn_target)
    attn_p = _pad_rows(attn2d, m_pad)
    res_p = _pad_rows(residual2d, m_pad)
    cost = pl.CostEstimate(flops=int(2 * m_pad * N * H + m_pad * H),
                           transcendentals=0,
                           bytes_accessed=int(2 * m_pad * N + 2 * N * H + 8 * m_pad * H))
    out = pl.pallas_call(
        _o_proj_residual_kernel,
        grid=(m_pad // tm, N // tn),               # contraction axis last
        in_specs=[pl.BlockSpec((tm, tn), lambda i, j: (i, j)),
                  pl.BlockSpec((tn, H), lambda i, j: (j, 0)),
                  pl.BlockSpec((tm, H), lambda i, j: (i, 0))],
        out_specs=pl.BlockSpec((tm, H), lambda i, j: (i, 0)),
        out_shape=jax.ShapeDtypeStruct((m_pad, H), jnp.float32),
        scratch_shapes=[pltpu.VMEM((tm, H), jnp.float32)],
        input_output_aliases={2: 0},               # residual -> output
        compiler_params=_cparams(("parallel", "arbitrary"), vmem_bytes),
        cost_estimate=cost,
    )(attn_p, wo, res_p)
    return out[:M] if m_pad != M else out


# --------------------------------------------------------------------------
# Kernel D: fused RMSNorm + SwiGLU MLP + residual, intermediate dim tiled as a
#   reduction grid axis with an f32 VMEM accumulator; input aliased to output.
# --------------------------------------------------------------------------

def _mlp_kernel(x_ref, lnw_ref, wg_ref, wu_ref, wd_ref, o_ref,
                xn_scr, acc_scr, *, eps):
    j = pl.program_id(1)

    @pl.when(j == 0)
    def _init():
        x = x_ref[...].astype(jnp.float32)
        var = jnp.mean(x * x, axis=-1, keepdims=True)
        xn = x * jax.lax.rsqrt(var + eps) * lnw_ref[...].astype(jnp.float32)
        xn_scr[...] = xn.astype(xn_scr.dtype)
        acc_scr[...] = jnp.zeros(acc_scr.shape, dtype=jnp.float32)

    xn = xn_scr[...]
    g = jnp.dot(xn, wg_ref[...], preferred_element_type=jnp.float32)
    u = jnp.dot(xn, wu_ref[...], preferred_element_type=jnp.float32)
    h = (g * jax.nn.sigmoid(g)) * u                       # SiLU(gate) * up, f32
    acc_scr[...] += jnp.dot(h.astype(wd_ref.dtype), wd_ref[...],
                            preferred_element_type=jnp.float32)

    @pl.when(j == pl.num_programs(1) - 1)
    def _finalize():
        o_ref[...] = (x_ref[...].astype(jnp.float32) +
                      acc_scr[...]).astype(o_ref.dtype)


def mlp_block(h2d, ln_w, wg, wu, wd, eps, *, tm_target, ti_target, vmem_bytes):
    M, H = h2d.shape
    I = wg.shape[1]
    tm, m_pad = _row_tile(M, tm_target)
    ti = _lane_tile(I, ti_target)
    h_p = _pad_rows(h2d, m_pad)
    cost = pl.CostEstimate(flops=int(6 * m_pad * H * I + 2 * m_pad * I + 3 * m_pad * H),
                           transcendentals=int(m_pad * I + m_pad),
                           bytes_accessed=int(8 * m_pad * H + 2 * 3 * H * I + 4 * H))
    out = pl.pallas_call(
        functools.partial(_mlp_kernel, eps=eps),
        grid=(m_pad // tm, I // ti),               # reduction axis (I tiles) last
        in_specs=[pl.BlockSpec((tm, H), lambda i, j: (i, 0)),
                  pl.BlockSpec((1, H), lambda i, j: (0, 0)),
                  pl.BlockSpec((H, ti), lambda i, j: (0, j)),
                  pl.BlockSpec((H, ti), lambda i, j: (0, j)),
                  pl.BlockSpec((ti, H), lambda i, j: (j, 0))],
        out_specs=pl.BlockSpec((tm, H), lambda i, j: (i, 0)),
        out_shape=jax.ShapeDtypeStruct((m_pad, H), jnp.float32),
        scratch_shapes=[pltpu.VMEM((tm, H), COMPUTE_DTYPE),   # normalized acts
                        pltpu.VMEM((tm, H), jnp.float32)],    # f32 accumulator
        input_output_aliases={0: 0},               # residual stream in-place
        compiler_params=_cparams(("parallel", "arbitrary"), vmem_bytes),
        cost_estimate=cost,
    )(h_p, ln_w.reshape(1, H), wg, wu, wd)
    return out[:M] if m_pad != M else out


# --------------------------------------------------------------------------
# Kernel E: final RMSNorm
# --------------------------------------------------------------------------

def _rmsnorm_kernel(x_ref, w_ref, o_ref, *, eps):
    x = x_ref[...].astype(jnp.float32)
    var = jnp.mean(x * x, axis=-1, keepdims=True)
    o_ref[...] = (x * jax.lax.rsqrt(var + eps) * w_ref[...]).astype(o_ref.dtype)


def rmsnorm(x2d, w, eps, *, tm_target, vmem_bytes):
    M, H = x2d.shape
    tm, m_pad = _row_tile(M, tm_target)
    x_p = _pad_rows(x2d, m_pad)
    out = pl.pallas_call(
        functools.partial(_rmsnorm_kernel, eps=eps),
        grid=(m_pad // tm,),
        in_specs=[pl.BlockSpec((tm, H), lambda i: (i, 0)),
                  pl.BlockSpec((1, H), lambda i: (0, 0))],
        out_specs=pl.BlockSpec((tm, H), lambda i: (i, 0)),
        out_shape=jax.ShapeDtypeStruct((m_pad, H), jnp.float32),
        compiler_params=_cparams(("parallel",), vmem_bytes),
        cost_estimate=pl.CostEstimate(flops=int(3 * m_pad * H),
                                      transcendentals=int(m_pad),
                                      bytes_accessed=int(8 * m_pad * H + 4 * H)),
    )(x_p, w.reshape(1, H))
    return out[:M] if m_pad != M else out


# ------------------------------- glue (JAX) --------------------------------

def rope_tables(head_dim, seq_len, base):
    inv_freq = 1.0 / (base ** (jnp.arange(0, head_dim, 2, dtype=jnp.float32) / head_dim))
    t = jnp.arange(seq_len, dtype=jnp.float32)
    freqs = jnp.einsum('i,j->ij', t, inv_freq)
    emb = jnp.concatenate([freqs, freqs], axis=-1)
    return jnp.cos(emb), jnp.sin(emb)              # (S, D) each, f32


# ------------------------------ model pieces -------------------------------

class SmallConfig:
    vocab_size = 128
    hidden_size = 32
    intermediate_size = 64
    num_hidden_layers = 2
    num_attention_heads = 4
    num_key_value_heads = 2
    head_dim = 32 // 4
    rms_norm_eps = 1e-6
    rope_theta = 10000.0
    max_position_embeddings = 64
    initializer_range = 0.02


def init_params(cfg, key):
    std = cfg.initializer_range
    H, I, D = cfg.hidden_size, cfg.intermediate_size, cfg.head_dim
    nH, nKV = cfg.num_attention_heads, cfg.num_key_value_heads

    def linear_w(k, shape):     # stored [in, out] (torch weight transposed), bf16
        return (std * jax.random.normal(k, shape, dtype=jnp.float32)).astype(COMPUTE_DTYPE)

    keys = jax.random.split(key, 1 + 7 * cfg.num_hidden_layers)
    params = {'embed': std * jax.random.normal(keys[0], (cfg.vocab_size, H), jnp.float32),
              'final_norm': jnp.ones((H,), jnp.float32),
              'layers': []}
    ki = 1
    for _ in range(cfg.num_hidden_layers):
        wq = linear_w(keys[ki + 0], (H, nH * D))
        wk = linear_w(keys[ki + 1], (H, nKV * D))
        wv = linear_w(keys[ki + 2], (H, nKV * D))
        lp = {
            # q/k/v projection weights pre-concatenated -> one wide matmul
            'wqkv': jnp.concatenate([wq, wk, wv], axis=1),
            'wo': linear_w(keys[ki + 3], (nH * D, H)),
            'wg': linear_w(keys[ki + 4], (H, I)),
            'wu': linear_w(keys[ki + 5], (H, I)),
            'wd': linear_w(keys[ki + 6], (I, H)),
            'ln_in': jnp.ones((H,), jnp.float32),
            'ln_post': jnp.ones((H,), jnp.float32),
        }
        ki += 7
        params['layers'].append(lp)
    return params


def transformer_forward(cfg, params, input_ids, tune=None):
    tune = tune or _chip_defaults()
    B, S = input_ids.shape
    H, D = cfg.hidden_size, cfg.head_dim
    nH, nKV = cfg.num_attention_heads, cfg.num_key_value_heads
    n_rep = nH // nKV
    M = B * S
    vb = tune['vmem_bytes']

    # embedding gather (glue)
    hidden = jnp.take(params['embed'], input_ids, axis=0).reshape(M, H)   # f32

    # per-token RoPE tables (default position_ids = arange(S)), built once
    cos, sin = rope_tables(D, S, cfg.rope_theta)
    cos_m = jnp.tile(cos, (B, 1))                  # (M, D)
    sin_m = jnp.tile(sin, (B, 1))

    for lp in params['layers']:
        # --- attention block ---
        q2d, k2d, v2d = rms_qkv_rope(hidden, lp['ln_in'], lp['wqkv'],
                                     cos_m, sin_m, cfg.rms_norm_eps,
                                     n_heads=nH, n_kv_heads=nKV, head_dim=D,
                                     tm_target=tune['tm'], vmem_bytes=vb)
        # TODO(synk): the head-major transposes below remain XLA glue; a fully
        # transpose-free layout needs head-strided out_specs in Kernel A and a
        # head-reduction axis in Kernel C.
        q = (q2d.reshape(B, S, nKV, n_rep, D).transpose(0, 2, 3, 1, 4)
                 .reshape(B * nKV, n_rep, S, D))
        k = k2d.reshape(B, S, nKV, D).transpose(0, 2, 1, 3).reshape(B * nKV, S, D)
        v = v2d.reshape(B, S, nKV, D).transpose(0, 2, 1, 3).reshape(B * nKV, S, D)

        attn = flash_attention(q, k, v, n_rep=n_rep,
                               tq_target=tune['tq'], tk_target=tune['tk'],
                               vmem_bytes=vb)                 # (B*nKV, n_rep, S, D)
        attn2d = (attn.reshape(B, nKV, n_rep, S, D).transpose(0, 3, 1, 2, 4)
                      .reshape(M, nH * D))
        hidden = o_proj_residual(attn2d, lp['wo'], hidden,
                                 tm_target=tune['tm'], tn_target=tune['tn'],
                                 vmem_bytes=vb)               # f32 (M, H)

        # --- MLP block (rmsnorm + SwiGLU + down + residual fused) ---
        hidden = mlp_block(hidden, lp['ln_post'], lp['wg'], lp['wu'], lp['wd'],
                           cfg.rms_norm_eps, tm_target=tune['tm'],
                           ti_target=tune['ti'], vmem_bytes=vb)

    hidden = rmsnorm(hidden, params['final_norm'], cfg.rms_norm_eps,
                     tm_target=tune['tm'], vmem_bytes=vb)
    # TODO(synk): KV-cache (use_cache=True), attention_mask / sliding-window
    # masking and arbitrary position_ids are not implemented; this reproduces
    # the prefill path with attention_mask=None (softmax over full sequence,
    # matching the reference, which applies no mask when none is given).
    return {'last_hidden_state': hidden.reshape(B, S, H),
            'past_key_values': None,
            'hidden_states': None,
            'attentions': None}


# ---------------------------------- main ------------------------------------

if __name__ == "__main__":
    cfg = SmallConfig()
    key = jax.random.PRNGKey(0)
    pkey, ikey = jax.random.split(key)

    params = init_params(cfg, pkey)

    batch, seq = 2, 8
    input_ids = jax.random.randint(ikey, (batch, seq), 0, cfg.vocab_size,
                                   dtype=jnp.int32)

    tune = _chip_defaults()
    fwd = jax.jit(functools.partial(transformer_forward, cfg, tune=tune))
    out = fwd(params, input_ids)
    last = jax.block_until_ready(out['last_hidden_state'])

    assert last.shape == (batch, seq, cfg.hidden_size)
    assert bool(jnp.all(jnp.isfinite(last)))
    print("KERNEL_OK")
</pallas_src>

<mosaic_0001>
module attributes {stable_mosaic.version = 11 : i64} {
  func.func @_rms_qkv_rope_kernel(%arg0: i32, %arg1: memref<16x32xf32, #tpu.memory_space<vmem>>, %arg2: memref<1x32xf32, #tpu.memory_space<vmem>>, %arg3: memref<32x64xbf16, #tpu.memory_space<vmem>>, %arg4: memref<16x8xf32, #tpu.memory_space<vmem>>, %arg5: memref<16x8xf32, #tpu.memory_space<vmem>>, %arg6: memref<16x32xbf16, #tpu.memory_space<vmem>>, %arg7: memref<16x16xbf16, #tpu.memory_space<vmem>>, %arg8: memref<16x16xbf16, #tpu.memory_space<vmem>>) attributes {dimension_semantics = [#tpu.dimension_semantics<parallel>], iteration_bounds = array<i64: 1>, scalar_prefetch = 0 : i64, scratch_operands = 0 : i64, tpu.core_type = #tpu.core_type<tc>, window_params = [{transform_indices = @transform_0, window_bounds = array<i64: 16, 32>}, {pipeline_mode = #tpu.pipeline_mode<synchronous>, transform_indices = @transform_1, window_bounds = array<i64: 1, 32>}, {pipeline_mode = #tpu.pipeline_mode<synchronous>, transform_indices = @transform_2, window_bounds = array<i64: 32, 64>}, {transform_indices = @transform_3, window_bounds = array<i64: 16, 8>}, {transform_indices = @transform_4, window_bounds = array<i64: 16, 8>}, {transform_indices = @transform_5, window_bounds = array<i64: 16, 32>}, {transform_indices = @transform_6, window_bounds = array<i64: 16, 16>}, {transform_indices = @transform_7, window_bounds = array<i64: 16, 16>}]} {
    %c0 = arith.constant 0 : index
    %c0_0 = arith.constant 0 : index
    %0 = vector.load %arg1[%c0, %c0_0] : memref<16x32xf32, #tpu.memory_space<vmem>>, vector<16x32xf32>
    %1 = arith.mulf %0, %0 : vector<16x32xf32>
    %cst = arith.constant dense<0.000000e+00> : vector<16xf32>
    %2 = vector.multi_reduction <add>, %1, %cst [1] : vector<16x32xf32> to vector<16xf32>
    %3 = vector.shape_cast %2 : vector<16xf32> to vector<16x1xf32>
    %cst_1 = arith.constant 3.200000e+01 : f32
    %4 = vector.broadcast %cst_1 : f32 to vector<16x1xf32>
    %5 = arith.divf %3, %4 : vector<16x1xf32>
    %cst_2 = arith.constant 9.99999997E-7 : f32
    %6 = vector.broadcast %cst_2 : f32 to vector<16x1xf32>
    %7 = arith.addf %5, %6 : vector<16x1xf32>
    %8 = math.rsqrt %7 : vector<16x1xf32>
    %9 = vector.broadcast %8 : vector<16x1xf32> to vector<16x32xf32>
    %10 = arith.mulf %0, %9 : vector<16x32xf32>
    %c0_3 = arith.constant 0 : index
    %c0_4 = arith.constant 0 : index
    %11 = vector.load %arg2[%c0_3, %c0_4] : memref<1x32xf32, #tpu.memory_space<vmem>>, vector<1x32xf32>
    %12 = vector.broadcast %11 : vector<1x32xf32> to vector<16x32xf32>
    %13 = arith.mulf %10, %12 : vector<16x32xf32>
    %14 = arith.truncf %13 : vector<16x32xf32> to vector<16x32xbf16>
    %c0_5 = arith.constant 0 : index
    %c0_6 = arith.constant 0 : index
    %15 = vector.load %arg3[%c0_5, %c0_6] : memref<32x64xbf16, #tpu.memory_space<vmem>>, vector<32x64xbf16>
    %cst_7 = arith.constant dense<0.000000e+00> : vector<16x64xf32>
    %16 = tpu.matmul %14, %15, %cst_7 {dimension_numbers = #tpu.dot_dimension_numbers<[1], [0], [0], [1], [0, 0, 1, 1], [], []>} : vector<16x32xbf16>, vector<32x64xbf16>, vector<16x64xf32> -> vector<16x64xf32>
    %c0_8 = arith.constant 0 : index
    %c0_9 = arith.constant 0 : index
    %17 = vector.load %arg4[%c0_8, %c0_9] : memref<16x8xf32, #tpu.memory_space<vmem>>, vector<16x8xf32>
    %c0_10 = arith.constant 0 : index
    %c0_11 = arith.constant 0 : index
    %18 = vector.load %arg5[%c0_10, %c0_11] : memref<16x8xf32, #tpu.memory_space<vmem>>, vector<16x8xf32>
    %19 = vector.extract_strided_slice %16 {offsets = [0, 0], sizes = [16, 32], strides = [1, 1]} : vector<16x64xf32> to vector<16x32xf32>
    %20 = vector.extract_strided_slice %19 {offsets = [0, 0], sizes = [16, 8], strides = [1, 1]} : vector<16x32xf32> to vector<16x8xf32>
    %21 = vector.extract_strided_slice %20 {offsets = [0, 4], sizes = [16, 4], strides = [1, 1]} : vector<16x8xf32> to vector<16x4xf32>
    %cst_12 = arith.constant 0.000000e+00 : f32
    %22 = vector.broadcast %cst_12 : f32 to vector<16x4xf32>
    %23 = arith.subf %22, %21 : vector<16x4xf32>
    %24 = vector.extract_strided_slice %20 {offsets = [0, 0], sizes = [16, 4], strides = [1, 1]} : vector<16x8xf32> to vector<16x4xf32>
    %25 = tpu.concatenate %23, %24 in 1 : vector<16x4xf32>, vector<16x4xf32> -> vector<16x8xf32>
    %26 = arith.mulf %20, %17 : vector<16x8xf32>
    %27 = arith.mulf %25, %18 : vector<16x8xf32>
    %28 = arith.addf %26, %27 : vector<16x8xf32>
    %cst_13 = arith.constant 0.353553385 : f32
    %29 = vector.broadcast %cst_13 : f32 to vector<16x8xf32>
    %30 = arith.mulf %28, %29 : vector<16x8xf32>
    %31 = vector.extract_strided_slice %19 {offsets = [0, 8], sizes = [16, 8], strides = [1, 1]} : vector<16x32xf32> to vector<16x8xf32>
    %32 = vector.extract_strided_slice %31 {offsets = [0, 4], sizes = [16, 4], strides = [1, 1]} : vector<16x8xf32> to vector<16x4xf32>
    %cst_14 = arith.constant 0.000000e+00 : f32
    %33 = vector.broadcast %cst_14 : f32 to vector<16x4xf32>
    %34 = arith.subf %33, %32 : vector<16x4xf32>
    %35 = vector.extract_strided_slice %31 {offsets = [0, 0], sizes = [16, 4], strides = [1, 1]} : vector<16x8xf32> to vector<16x4xf32>
    %36 = tpu.concatenate %34, %35 in 1 : vector<16x4xf32>, vector<16x4xf32> -> vector<16x8xf32>
    %37 = arith.mulf %31, %17 : vector<16x8xf32>
    %38 = arith.mulf %36, %18 : vector<16x8xf32>
    %39 = arith.addf %37, %38 : vector<16x8xf32>
    %cst_15 = arith.constant 0.353553385 : f32
    %40 = vector.broadcast %cst_15 : f32 to vector<16x8xf32>
    %41 = arith.mulf %39, %40 : vector<16x8xf32>
    %42 = vector.extract_strided_slice %19 {offsets = [0, 16], sizes = [16, 8], strides = [1, 1]} : vector<16x32xf32> to vector<16x8xf32>
    %43 = vector.extract_strided_slice %42 {offsets = [0, 4], sizes = [16, 4], strides = [1, 1]} : vector<16x8xf32> to vector<16x4xf32>
    %cst_16 = arith.constant 0.000000e+00 : f32
    %44 = vector.broadcast %cst_16 : f32 to vector<16x4xf32>
    %45 = arith.subf %44, %43 : vector<16x4xf32>
    %46 = vector.extract_strided_slice %42 {offsets = [0, 0], sizes = [16, 4], strides = [1, 1]} : vector<16x8xf32> to vector<16x4xf32>
    %47 = tpu.concatenate %45, %46 in 1 : vector<16x4xf32>, vector<16x4xf32> -> vector<16x8xf32>
    %48 = arith.mulf %42, %17 : vector<16x8xf32>
    %49 = arith.mulf %47, %18 : vector<16x8xf32>
    %50 = arith.addf %48, %49 : vector<16x8xf32>
    %cst_17 = arith.constant 0.353553385 : f32
    %51 = vector.broadcast %cst_17 : f32 to vector<16x8xf32>
    %52 = arith.mulf %50, %51 : vector<16x8xf32>
    %53 = vector.extract_strided_slice %19 {offsets = [0, 24], sizes = [16, 8], strides = [1, 1]} : vector<16x32xf32> to vector<16x8xf32>
    %54 = vector.extract_strided_slice %53 {offsets = [0, 4], sizes = [16, 4], strides = [1, 1]} : vector<16x8xf32> to vector<16x4xf32>
    %cst_18 = arith.constant 0.000000e+00 : f32
    %55 = vector.broadcast %cst_18 : f32 to vector<16x4xf32>
    %56 = arith.subf %55, %54 : vector<16x4xf32>
    %57 = vector.extract_strided_slice %53 {offsets = [0, 0], sizes = [16, 4], strides = [1, 1]} : vector<16x8xf32> to vector<16x4xf32>
    %58 = tpu.concatenate %56, %57 in 1 : vector<16x4xf32>, vector<16x4xf32> -> vector<16x8xf32>
    %59 = arith.mulf %53, %17 : vector<16x8xf32>
    %60 = arith.mulf %58, %18 : vector<16x8xf32>
    %61 = arith.addf %59, %60 : vector<16x8xf32>
    %cst_19 = arith.constant 0.353553385 : f32
    %62 = vector.broadcast %cst_19 : f32 to vector<16x8xf32>
    %63 = arith.mulf %61, %62 : vector<16x8xf32>
    %64 = tpu.concatenate %30, %41, %52, %63 in 1 : vector<16x8xf32>, vector<16x8xf32>, vector<16x8xf32>, vector<16x8xf32> -> vector<16x32xf32>
    %65 = arith.truncf %64 : vector<16x32xf32> to vector<16x32xbf16>
    %c0_20 = arith.constant 0 : index
    %c0_21 = arith.constant 0 : index
    %66 = vector.load %arg6[%c0_20, %c0_21] : memref<16x32xbf16, #tpu.memory_space<vmem>>, vector<16x32xbf16>
    tpu.vector_store %arg6[%c0_20, %c0_21], %65 {strides = array<i32>} : memref<16x32xbf16, #tpu.memory_space<vmem>>, vector<16x32xbf16>,
    %67 = vector.extract_strided_slice %16 {offsets = [0, 32], sizes = [16, 16], strides = [1, 1]} : vector<16x64xf32> to vector<16x16xf32>
    %68 = vector.extract_strided_slice %67 {offsets = [0, 0], sizes = [16, 8], strides = [1, 1]} : vector<16x16xf32> to vector<16x8xf32>
    %69 = vector.extract_strided_slice %68 {offsets = [0, 4], sizes = [16, 4], strides = [1, 1]} : vector<16x8xf32> to vector<16x4xf32>
    %cst_22 = arith.constant 0.000000e+00 : f32
    %70 = vector.broadcast %cst_22 : f32 to vector<16x4xf32>
    %71 = arith.subf %70, %69 : vector<16x4xf32>
    %72 = vector.extract_strided_slice %68 {offsets = [0, 0], sizes = [16, 4], strides = [1, 1]} : vector<16x8xf32> to vector<16x4xf32>
    %73 = tpu.concatenate %71, %72 in 1 : vector<16x4xf32>, vector<16x4xf32> -> vector<16x8xf32>
    %74 = arith.mulf %68, %17 : vector<16x8xf32>
    %75 = arith.mulf %73, %18 : vector<16x8xf32>
    %76 = arith.addf %74, %75 : vector<16x8xf32>
    %cst_23 = arith.constant 1.000000e+00 : f32
    %77 = vector.broadcast %cst_23 : f32 to vector<16x8xf32>
    %78 = arith.mulf %76, %77 : vector<16x8xf32>
    %79 = vector.extract_strided_slice %67 {offsets = [0, 8], sizes = [16, 8], strides = [1, 1]} : vector<16x16xf32> to vector<16x8xf32>
    %80 = vector.extract_strided_slice %79 {offsets = [0, 4], sizes = [16, 4], strides = [1, 1]} : vector<16x8xf32> to vector<16x4xf32>
    %cst_24 = arith.constant 0.000000e+00 : f32
    %81 = vector.broadcast %cst_24 : f32 to vector<16x4xf32>
    %82 = arith.subf %81, %80 : vector<16x4xf32>
    %83 = vector.extract_strided_slice %79 {offsets = [0, 0], sizes = [16, 4], strides = [1, 1]} : vector<16x8xf32> to vector<16x4xf32>
    %84 = tpu.concatenate %82, %83 in 1 : vector<16x4xf32>, vector<16x4xf32> -> vector<16x8xf32>
    %85 = arith.mulf %79, %17 : vector<16x8xf32>
    %86 = arith.mulf %84, %18 : vector<16x8xf32>
    %87 = arith.addf %85, %86 : vector<16x8xf32>
    %cst_25 = arith.constant 1.000000e+00 : f32
    %88 = vector.broadcast %cst_25 : f32 to vector<16x8xf32>
    %89 = arith.mulf %87, %88 : vector<16x8xf32>
    %90 = tpu.concatenate %78, %89 in 1 : vector<16x8xf32>, vector<16x8xf32> -> vector<16x16xf32>
    %91 = arith.truncf %90 : vector<16x16xf32> to vector<16x16xbf16>
    %c0_26 = arith.constant 0 : index
    %c0_27 = arith.constant 0 : index
    %92 = vector.load %arg7[%c0_26, %c0_27] : memref<16x16xbf16, #tpu.memory_space<vmem>>, vector<16x16xbf16>
    tpu.vector_store %arg7[%c0_26, %c0_27], %91 {strides = array<i32>} : memref<16x16xbf16, #tpu.memory_space<vmem>>, vector<16x16xbf16>,
    %93 = vector.extract_strided_slice %16 {offsets = [0, 48], sizes = [16, 16], strides = [1, 1]} : vector<16x64xf32> to vector<16x16xf32>
    %94 = arith.truncf %93 : vector<16x16xf32> to vector<16x16xbf16>
    %c0_28 = arith.constant 0 : index
    %c0_29 = arith.constant 0 : index
    %95 = vector.load %arg8[%c0_28, %c0_29] : memref<16x16xbf16, #tpu.memory_space<vmem>>, vector<16x16xbf16>
    tpu.vector_store %arg8[%c0_28, %c0_29], %94 {strides = array<i32>} : memref<16x16xbf16, #tpu.memory_space<vmem>>, vector<16x16xbf16>,
    return
  }
  func.func @transform_0(%arg0: i32) -> (i32, i32) {
    %c0_i32 = arith.constant 0 : i32
    %c0_i32_0 = arith.constant 0 : i32
    return %arg0, %c0_i32 : i32, i32
  }
  func.func @transform_1(%arg0: i32) -> (i32, i32) {
    %c0_i32 = arith.constant 0 : i32
    %c0_i32_0 = arith.constant 0 : i32
    %c0_i32_1 = arith.constant 0 : i32
    return %c0_i32, %c0_i32_0 : i32, i32
  }
  func.func @transform_2(%arg0: i32) -> (i32, i32) {
    %c0_i32 = arith.constant 0 : i32
    %c0_i32_0 = arith.constant 0 : i32
    %c0_i32_1 = arith.constant 0 : i32
    return %c0_i32, %c0_i32_0 : i32, i32
  }
  func.func @transform_3(%arg0: i32) -> (i32, i32) {
    %c0_i32 = arith.constant 0 : i32
    %c0_i32_0 = arith.constant 0 : i32
    return %arg0, %c0_i32 : i32, i32
  }
  func.func @transform_4(%arg0: i32) -> (i32, i32) {
    %c0_i32 = arith.constant 0 : i32
    %c0_i32_0 = arith.constant 0 : i32
    return %arg0, %c0_i32 : i32, i32
  }
  func.func @transform_5(%arg0: i32) -> (i32, i32) {
    %c0_i32 = arith.constant 0 : i32
    %c0_i32_0 = arith.constant 0 : i32
    return %arg0, %c0_i32 : i32, i32
  }
  func.func @transform_6(%arg0: i32) -> (i32, i32) {
    %c0_i32 = arith.constant 0 : i32
    %c0_i32_0 = arith.constant 0 : i32
    return %arg0, %c0_i32 : i32, i32
  }
  func.func @transform_7(%arg0: i32) -> (i32, i32) {
    %c0_i32 = arith.constant 0 : i32
    %c0_i32_0 = arith.constant 0 : i32
    return %arg0, %c0_i32 : i32, i32
  }
}

module attributes {stable_mosaic.version = 11 : i64} {
  func.func @_o_proj_residual_kernel(%arg0: i32, %arg1: i32, %arg2: memref<16x32xbf16, #tpu.memory_space<vmem>>, %arg3: memref<32x32xbf16, #tpu.memory_space<vmem>>, %arg4: memref<16x32xf32, #tpu.memory_space<vmem>>, %arg5: memref<16x32xf32, #tpu.memory_space<vmem>>, %arg6: memref<16x32xf32, #tpu.memory_space<vmem>>) attributes {dimension_semantics = [#tpu.dimension_semantics<parallel>, #tpu.dimension_semantics<arbitrary>], iteration_bounds = array<i64: 1, 1>, scalar_prefetch = 0 : i64, scratch_operands = 1 : i64, tpu.core_type = #tpu.core_type<tc>, window_params = [{transform_indices = @transform_0, window_bounds = array<i64: 16, 32>}, {transform_indices = @transform_1, window_bounds = array<i64: 32, 32>}, {transform_indices = @transform_2, window_bounds = array<i64: 16, 32>}, {transform_indices = @transform_3, window_bounds = array<i64: 16, 32>}]} {
    %c0_i32 = arith.constant 0 : i32
    %0 = arith.cmpi eq, %arg1, %c0_i32 : i32
    %1 = arith.extui %0 : i1 to i32
    %c0_i32_0 = arith.constant 0 : i32
    %2 = arith.cmpi ne, %1, %c0_i32_0 : i32
    scf.if %2 {
      %cst_10 = arith.constant 0.000000e+00 : f32
      %12 = vector.broadcast %cst_10 : f32 to vector<16x32xf32>
      %c0_11 = arith.constant 0 : index
      %c0_12 = arith.constant 0 : index
      %13 = vector.load %arg6[%c0_11, %c0_12] : memref<16x32xf32, #tpu.memory_space<vmem>>, vector<16x32xf32>
      tpu.vector_store %arg6[%c0_11, %c0_12], %12 {strides = array<i32>} : memref<16x32xf32, #tpu.memory_space<vmem>>, vector<16x32xf32>,
    } else {
    }
    %c0 = arith.constant 0 : index
    %c0_1 = arith.constant 0 : index
    %3 = vector.load %arg6[%c0, %c0_1] : memref<16x32xf32, #tpu.memory_space<vmem>>, vector<16x32xf32>
    %c0_2 = arith.constant 0 : index
    %c0_3 = arith.constant 0 : index
    %4 = vector.load %arg2[%c0_2, %c0_3] : memref<16x32xbf16, #tpu.memory_space<vmem>>, vector<16x32xbf16>
    %c0_4 = arith.constant 0 : index
    %c0_5 = arith.constant 0 : index
    %5 = vector.load %arg3[%c0_4, %c0_5] : memref<32x32xbf16, #tpu.memory_space<vmem>>, vector<32x32xbf16>
    %cst = arith.constant dense<0.000000e+00> : vector<16x32xf32>
    %6 = tpu.matmul %4, %5, %cst {dimension_numbers = #tpu.dot_dimension_numbers<[1], [0], [0], [1], [0, 0, 1, 1], [], []>} : vector<16x32xbf16>, vector<32x32xbf16>, vector<16x32xf32> -> vector<16x32xf32>
    %7 = arith.addf %3, %6 : vector<16x32xf32>
    %c0_6 = arith.constant 0 : index
    %c0_7 = arith.constant 0 : index
    %8 = vector.load %arg6[%c0_6, %c0_7] : memref<16x32xf32, #tpu.memory_space<vmem>>, vector<16x32xf32>
    tpu.vector_store %arg6[%c0_6, %c0_7], %7 {strides = array<i32>} : memref<16x32xf32, #tpu.memory_space<vmem>>, vector<16x32xf32>,
    %c0_i32_8 = arith.constant 0 : i32
    %9 = arith.cmpi eq, %arg1, %c0_i32_8 : i32
    %10 = arith.extui %9 : i1 to i32
    %c0_i32_9 = arith.constant 0 : i32
    %11 = arith.cmpi ne, %10, %c0_i32_9 : i32
    scf.if %11 {
      %c0_10 = arith.constant 0 : index
      %c0_11 = arith.constant 0 : index
      %12 = vector.load %arg4[%c0_10, %c0_11] : memref<16x32xf32, #tpu.memory_space<vmem>>, vector<16x32xf32>
      %c0_12 = arith.constant 0 : index
      %c0_13 = arith.constant 0 : index
      %13 = vector.load %arg6[%c0_12, %c0_13] : memref<16x32xf32, #tpu.memory_space<vmem>>, vector<16x32xf32>
      %14 = arith.addf %12, %13 : vector<16x32xf32>
      %c0_14 = arith.constant 0 : index
      %c0_15 = arith.constant 0 : index
      %15 = vector.load %arg5[%c0_14, %c0_15] : memref<16x32xf32, #tpu.memory_space<vmem>>, vector<16x32xf32>
      tpu.vector_store %arg5[%c0_14, %c0_15], %14 {strides = array<i32>} : memref<16x32xf32, #tpu.memory_space<vmem>>, vector<16x32xf32>,
    } else {
    }
    return
  }
  func.func @transform_0(%arg0: i32, %arg1: i32) -> (i32, i32) {
    %c0_i32 = arith.constant 0 : i32
    return %arg0, %arg1 : i32, i32
  }
  func.func @transform_1(%arg0: i32, %arg1: i32) -> (i32, i32) {
    %c0_i32 = arith.constant 0 : i32
    %c0_i32_0 = arith.constant 0 : i32
    return %arg1, %c0_i32 : i32, i32
  }
  func.func @transform_2(%arg0: i32, %arg1: i32) -> (i32, i32) {
    %c0_i32 = arith.constant 0 : i32
    %c0_i32_0 = arith.constant 0 : i32
    return %arg0, %c0_i32 : i32, i32
  }
  func.func @transform_3(%arg0: i32, %arg1: i32) -> (i32, i32) {
    %c0_i32 = arith.constant 0 : i32
    %c0_i32_0 = arith.constant 0 : i32
    return %arg0, %c0_i32 : i32, i32
  }
}

module attributes {stable_mosaic.version = 11 : i64} {
  func.func @_flash_attn_kernel(%arg0: i32, %arg1: i32, %arg2: i32, %arg3: memref<1x2x8x8xbf16, #tpu.memory_space<vmem>>, %arg4: memref<1x8x8xbf16, #tpu.memory_space<vmem>>, %arg5: memref<1x8x8xbf16, #tpu.memory_space<vmem>>, %arg6: memref<1x2x8x8xbf16, #tpu.memory_space<vmem>>, %arg7: memref<2x8x1xf32, #tpu.memory_space<vmem>>, %arg8: memref<2x8x1xf32, #tpu.memory_space<vmem>>, %arg9: memref<2x8x8xf32, #tpu.memory_space<vmem>>) attributes {dimension_semantics = [#tpu.dimension_semantics<parallel>, #tpu.dimension_semantics<parallel>, #tpu.dimension_semantics<arbitrary>], iteration_bounds = array<i64: 4, 1, 1>, scalar_prefetch = 0 : i64, scratch_operands = 3 : i64, tpu.core_type = #tpu.core_type<tc>, window_params = [{transform_indices = @transform_0, window_bounds = array<i64: 1, 2, 8, 8>}, {transform_indices = @transform_1, window_bounds = array<i64: 1, 8, 8>}, {transform_indices = @transform_2, window_bounds = array<i64: 1, 8, 8>}, {transform_indices = @transform_3, window_bounds = array<i64: 1, 2, 8, 8>}]} {
    %c0_i32 = arith.constant 0 : i32
    %0 = arith.cmpi eq, %arg2, %c0_i32 : i32
    %1 = arith.extui %0 : i1 to i32
    %c0_i32_0 = arith.constant 0 : i32
    %2 = arith.cmpi ne, %1, %c0_i32_0 : i32
    scf.if %2 {
      %cst_58 = arith.constant 0xFF800000 : f32
      %80 = vector.broadcast %cst_58 : f32 to vector<2x8x1xf32>
      %c0_59 = arith.constant 0 : index
      %c0_60 = arith.constant 0 : index
      %c0_61 = arith.constant 0 : index
      %81 = vector.load %arg7[%c0_59, %c0_60, %c0_61] : memref<2x8x1xf32, #tpu.memory_space<vmem>>, vector<2x8x1xf32>
      tpu.vector_store %arg7[%c0_59, %c0_60, %c0_61], %80 {strides = array<i32>} : memref<2x8x1xf32, #tpu.memory_space<vmem>>, vector<2x8x1xf32>,
      %cst_62 = arith.constant 0.000000e+00 : f32
      %82 = vector.broadcast %cst_62 : f32 to vector<2x8x1xf32>
      %c0_63 = arith.constant 0 : index
      %c0_64 = arith.constant 0 : index
      %c0_65 = arith.constant 0 : index
      %83 = vector.load %arg8[%c0_63, %c0_64, %c0_65] : memref<2x8x1xf32, #tpu.memory_space<vmem>>, vector<2x8x1xf32>
      tpu.vector_store %arg8[%c0_63, %c0_64, %c0_65], %82 {strides = array<i32>} : memref<2x8x1xf32, #tpu.memory_space<vmem>>, vector<2x8x1xf32>,
      %cst_66 = arith.constant 0.000000e+00 : f32
      %84 = vector.broadcast %cst_66 : f32 to vector<2x8x8xf32>
      %c0_67 = arith.constant 0 : index
      %c0_68 = arith.constant 0 : index
      %c0_69 = arith.constant 0 : index
      %85 = vector.load %arg9[%c0_67, %c0_68, %c0_69] : memref<2x8x8xf32, #tpu.memory_space<vmem>>, vector<2x8x8xf32>
      tpu.vector_store %arg9[%c0_67, %c0_68, %c0_69], %84 {strides = array<i32>} : memref<2x8x8xf32, #tpu.memory_space<vmem>>, vector<2x8x8xf32>,
    } else {
    }
    %c0 = arith.constant 0 : index
    %c0_1 = arith.constant 0 : index
    %c0_2 = arith.constant 0 : index
    %3 = vector.load %arg4[%c0, %c0_1, %c0_2] : memref<1x8x8xbf16, #tpu.memory_space<vmem>>, vector<1x8x8xbf16>
    %4 = vector.shape_cast %3 : vector<1x8x8xbf16> to vector<8x8xbf16>
    %c0_3 = arith.constant 0 : index
    %c0_4 = arith.constant 0 : index
    %c0_5 = arith.constant 0 : index
    %5 = vector.load %arg5[%c0_3, %c0_4, %c0_5] : memref<1x8x8xbf16, #tpu.memory_space<vmem>>, vector<1x8x8xbf16>
    %6 = vector.shape_cast %5 : vector<1x8x8xbf16> to vector<8x8xbf16>
    %c0_6 = arith.constant 0 : index
    %c0_7 = arith.constant 0 : index
    %c0_8 = arith.constant 0 : index
    %c0_9 = arith.constant 0 : index
    %7 = vector.load %arg3[%c0_6, %c0_7, %c0_8, %c0_9] : memref<1x2x8x8xbf16, #tpu.memory_space<vmem>>, vector<1x1x8x8xbf16>
    %8 = vector.shape_cast %7 : vector<1x1x8x8xbf16> to vector<8x8xbf16>
    %cst = arith.constant dense<0.000000e+00> : vector<8x8xf32>
    %9 = tpu.matmul %8, %4, %cst {dimension_numbers = #tpu.dot_dimension_numbers<[1], [1], [0], [0], [0, 0, 1, 0], [], []>} : vector<8x8xbf16>, vector<8x8xbf16>, vector<8x8xf32> -> vector<8x8xf32>
    %c0_10 = arith.constant 0 : index
    %c0_11 = arith.constant 0 : index
    %c0_12 = arith.constant 0 : index
    %10 = vector.load %arg7[%c0_10, %c0_11, %c0_12] : memref<2x8x1xf32, #tpu.memory_space<vmem>>, vector<1x8x1xf32>
    %11 = vector.shape_cast %10 : vector<1x8x1xf32> to vector<8x1xf32>
    %cst_13 = arith.constant dense<0xFF800000> : vector<8xf32>
    %12 = vector.multi_reduction <maximumf>, %9, %cst_13 [1] : vector<8x8xf32> to vector<8xf32>
    %13 = vector.shape_cast %12 : vector<8xf32> to vector<8x1xf32>
    %14 = arith.maximumf %11, %13 : vector<8x1xf32>
    %15 = arith.subf %11, %14 : vector<8x1xf32>
    %16 = math.exp %15 : vector<8x1xf32>
    %17 = vector.broadcast %14 : vector<8x1xf32> to vector<8x8xf32>
    %18 = arith.subf %9, %17 : vector<8x8xf32>
    %19 = math.exp %18 : vector<8x8xf32>
    %c0_14 = arith.constant 0 : index
    %c0_15 = arith.constant 0 : index
    %c0_16 = arith.constant 0 : index
    %20 = vector.load %arg8[%c0_14, %c0_15, %c0_16] : memref<2x8x1xf32, #tpu.memory_space<vmem>>, vector<1x8x1xf32>
    %21 = vector.shape_cast %20 : vector<1x8x1xf32> to vector<8x1xf32>
    %22 = arith.mulf %16, %21 : vector<8x1xf32>
    %cst_17 = arith.constant dense<0.000000e+00> : vector<8xf32>
    %23 = vector.multi_reduction <add>, %19, %cst_17 [1] : vector<8x8xf32> to vector<8xf32>
    %24 = vector.shape_cast %23 : vector<8xf32> to vector<8x1xf32>
    %25 = arith.addf %22, %24 : vector<8x1xf32>
    %c0_18 = arith.constant 0 : index
    %c0_19 = arith.constant 0 : index
    %c0_20 = arith.constant 0 : index
    %26 = vector.load %arg8[%c0_18, %c0_19, %c0_20] : memref<2x8x1xf32, #tpu.memory_space<vmem>>, vector<1x8x1xf32>
    %27 = vector.shape_cast %26 : vector<1x8x1xf32> to vector<8x1xf32>
    %28 = vector.shape_cast %25 : vector<8x1xf32> to vector<1x8x1xf32>
    tpu.vector_store %arg8[%c0_18, %c0_19, %c0_20], %28 {strides = array<i32>} : memref<2x8x1xf32, #tpu.memory_space<vmem>>, vector<1x8x1xf32>,
    %c0_21 = arith.constant 0 : index
    %c0_22 = arith.constant 0 : index
    %c0_23 = arith.constant 0 : index
    %29 = vector.load %arg9[%c0_21, %c0_22, %c0_23] : memref<2x8x8xf32, #tpu.memory_space<vmem>>, vector<1x8x8xf32>
    %30 = vector.shape_cast %29 : vector<1x8x8xf32> to vector<8x8xf32>
    %31 = vector.broadcast %16 : vector<8x1xf32> to vector<8x8xf32>
    %32 = arith.mulf %31, %30 : vector<8x8xf32>
    %33 = arith.truncf %19 : vector<8x8xf32> to vector<8x8xbf16>
    %cst_24 = arith.constant dense<0.000000e+00> : vector<8x8xf32>
    %34 = tpu.matmul %33, %6, %cst_24 {dimension_numbers = #tpu.dot_dimension_numbers<[1], [0], [0], [1], [0, 0, 1, 1], [], []>} : vector<8x8xbf16>, vector<8x8xbf16>, vector<8x8xf32> -> vector<8x8xf32>
    %35 = arith.addf %32, %34 : vector<8x8xf32>
    %c0_25 = arith.constant 0 : index
    %c0_26 = arith.constant 0 : index
    %c0_27 = arith.constant 0 : index
    %36 = vector.load %arg9[%c0_25, %c0_26, %c0_27] : memref<2x8x8xf32, #tpu.memory_space<vmem>>, vector<1x8x8xf32>
    %37 = vector.shape_cast %36 : vector<1x8x8xf32> to vector<8x8xf32>
    %38 = vector.shape_cast %35 : vector<8x8xf32> to vector<1x8x8xf32>
    tpu.vector_store %arg9[%c0_25, %c0_26, %c0_27], %38 {strides = array<i32>} : memref<2x8x8xf32, #tpu.memory_space<vmem>>, vector<1x8x8xf32>,
    %c0_28 = arith.constant 0 : index
    %c0_29 = arith.constant 0 : index
    %c0_30 = arith.constant 0 : index
    %39 = vector.load %arg7[%c0_28, %c0_29, %c0_30] : memref<2x8x1xf32, #tpu.memory_space<vmem>>, vector<1x8x1xf32>
    %40 = vector.shape_cast %39 : vector<1x8x1xf32> to vector<8x1xf32>
    %41 = vector.shape_cast %14 : vector<8x1xf32> to vector<1x8x1xf32>
    tpu.vector_store %arg7[%c0_28, %c0_29, %c0_30], %41 {strides = array<i32>} : memref<2x8x1xf32, #tpu.memory_space<vmem>>, vector<1x8x1xf32>,
    %c0_31 = arith.constant 0 : index
    %c1 = arith.constant 1 : index
    %c0_32 = arith.constant 0 : index
    %c0_33 = arith.constant 0 : index
    %42 = vector.load %arg3[%c0_31, %c1, %c0_32, %c0_33] : memref<1x2x8x8xbf16, #tpu.memory_space<vmem>>, vector<1x1x8x8xbf16>
    %43 = vector.shape_cast %42 : vector<1x1x8x8xbf16> to vector<8x8xbf16>
    %cst_34 = arith.constant dense<0.000000e+00> : vector<8x8xf32>
    %44 = tpu.matmul %43, %4, %cst_34 {dimension_numbers = #tpu.dot_dimension_numbers<[1], [1], [0], [0], [0, 0, 1, 0], [], []>} : vector<8x8xbf16>, vector<8x8xbf16>, vector<8x8xf32> -> vector<8x8xf32>
    %c1_35 = arith.constant 1 : index
    %c0_36 = arith.constant 0 : index
    %c0_37 = arith.constant 0 : index
    %45 = vector.load %arg7[%c1_35, %c0_36, %c0_37] : memref<2x8x1xf32, #tpu.memory_space<vmem>>, vector<1x8x1xf32>
    %46 = vector.shape_cast %45 : vector<1x8x1xf32> to vector<8x1xf32>
    %cst_38 = arith.constant dense<0xFF800000> : vector<8xf32>
    %47 = vector.multi_reduction <maximumf>, %44, %cst_38 [1] : vector<8x8xf32> to vector<8xf32>
    %48 = vector.shape_cast %47 : vector<8xf32> to vector<8x1xf32>
    %49 = arith.maximumf %46, %48 : vector<8x1xf32>
    %50 = arith.subf %46, %49 : vector<8x1xf32>
    %51 = math.exp %50 : vector<8x1xf32>
    %52 = vector.broadcast %49 : vector<8x1xf32> to vector<8x8xf32>
    %53 = arith.subf %44, %52 : vector<8x8xf32>
    %54 = math.exp %53 : vector<8x8xf32>
    %c1_39 = arith.constant 1 : index
    %c0_40 = arith.constant 0 : index
    %c0_41 = arith.constant 0 : index
    %55 = vector.load %arg8[%c1_39, %c0_40, %c0_41] : memref<2x8x1xf32, #tpu.memory_space<vmem>>, vector<1x8x1xf32>
    %56 = vector.shape_cast %55 : vector<1x8x1xf32> to vector<8x1xf32>
    %57 = arith.mulf %51, %56 : vector<8x1xf32>
    %cst_42 = arith.constant dense<0.000000e+00> : vector<8xf32>
    %58 = vector.multi_reduction <add>, %54, %cst_42 [1] : vector<8x8xf32> to vector<8xf32>
    %59 = vector.shape_cast %58 : vector<8xf32> to vector<8x1xf32>
    %60 = arith.addf %57, %59 : vector<8x1xf32>
    %c1_43 = arith.constant 1 : index
    %c0_44 = arith.constant 0 : index
    %c0_45 = arith.constant 0 : index
    %61 = vector.load %arg8[%c1_43, %c0_44, %c0_45] : memref<2x8x1xf32, #tpu.memory_space<vmem>>, vector<1x8x1xf32>
    %62 = vector.shape_cast %61 : vector<1x8x1xf32> to vector<8x1xf32>
    %63 = vector.shape_cast %60 : vector<8x1xf32> to vector<1x8x1xf32>
    tpu.vector_store %arg8[%c1_43, %c0_44, %c0_45], %63 {strides = array<i32>} : memref<2x8x1xf32, #tpu.memory_space<vmem>>, vector<1x8x1xf32>,
    %c1_46 = arith.constant 1 : index
    %c0_47 = arith.constant 0 : index
    %c0_48 = arith.constant 0 : index
    %64 = vector.load %arg9[%c1_46, %c0_47, %c0_48] : memref<2x8x8xf32, #tpu.memory_space<vmem>>, vector<1x8x8xf32>
    %65 = vector.shape_cast %64 : vector<1x8x8xf32> to vector<8x8xf32>
    %66 = vector.broadcast %51 : vector<8x1xf32> to vector<8x8xf32>
    %67 = arith.mulf %66, %65 : vector<8x8xf32>
    %68 = arith.truncf %54 : vector<8x8xf32> to vector<8x8xbf16>
    %cst_49 = arith.constant dense<0.000000e+00> : vector<8x8xf32>
    %69 = tpu.matmul %68, %6, %cst_49 {dimension_numbers = #tpu.dot_dimension_numbers<[1], [0], [0], [1], [0, 0, 1, 1], [], []>} : vector<8x8xbf16>, vector<8x8xbf16>, vector<8x8xf32> -> vector<8x8xf32>
    %70 = arith.addf %67, %69 : vector<8x8xf32>
    %c1_50 = arith.constant 1 : index
    %c0_51 = arith.constant 0 : index
    %c0_52 = arith.constant 0 : index
    %71 = vector.load %arg9[%c1_50, %c0_51, %c0_52] : memref<2x8x8xf32, #tpu.memory_space<vmem>>, vector<1x8x8xf32>
    %72 = vector.shape_cast %71 : vector<1x8x8xf32> to vector<8x8xf32>
    %73 = vector.shape_cast %70 : vector<8x8xf32> to vector<1x8x8xf32>
    tpu.vector_store %arg9[%c1_50, %c0_51, %c0_52], %73 {strides = array<i32>} : memref<2x8x8xf32, #tpu.memory_space<vmem>>, vector<1x8x8xf32>,
    %c1_53 = arith.constant 1 : index
    %c0_54 = arith.constant 0 : index
    %c0_55 = arith.constant 0 : index
    %74 = vector.load %arg7[%c1_53, %c0_54, %c0_55] : memref<2x8x1xf32, #tpu.memory_space<vmem>>, vector<1x8x1xf32>
    %75 = vector.shape_cast %74 : vector<1x8x1xf32> to vector<8x1xf32>
    %76 = vector.shape_cast %49 : vector<8x1xf32> to vector<1x8x1xf32>
    tpu.vector_store %arg7[%c1_53, %c0_54, %c0_55], %76 {strides = array<i32>} : memref<2x8x1xf32, #tpu.memory_space<vmem>>, vector<1x8x1xf32>,
    %c0_i32_56 = arith.constant 0 : i32
    %77 = arith.cmpi eq, %arg2, %c0_i32_56 : i32
    %78 = arith.extui %77 : i1 to i32
    %c0_i32_57 = arith.constant 0 : i32
    %79 = arith.cmpi ne, %78, %c0_i32_57 : i32
    scf.if %79 {
      %c0_58 = arith.constant 0 : index
      %c0_59 = arith.constant 0 : index
      %c0_60 = arith.constant 0 : index
      %80 = vector.load %arg9[%c0_58, %c0_59, %c0_60] : memref<2x8x8xf32, #tpu.memory_space<vmem>>, vector<2x8x8xf32>
      %c0_61 = arith.constant 0 : index
      %c0_62 = arith.constant 0 : index
      %c0_63 = arith.constant 0 : index
      %81 = vector.load %arg8[%c0_61, %c0_62, %c0_63] : memref<2x8x1xf32, #tpu.memory_space<vmem>>, vector<2x8x1xf32>
      %82 = tpu.reciprocal %81 {approx = true} : vector<2x8x1xf32> -> vector<2x8x1xf32>
      %83 = vector.broadcast %82 : vector<2x8x1xf32> to vector<2x8x8xf32>
      %84 = arith.mulf %80, %83 : vector<2x8x8xf32>
      %85 = arith.truncf %84 : vector<2x8x8xf32> to vector<2x8x8xbf16>
      %c0_64 = arith.constant 0 : index
      %c0_65 = arith.constant 0 : index
      %c0_66 = arith.constant 0 : index
      %c0_67 = arith.constant 0 : index
      %86 = vector.load %arg6[%c0_64, %c0_65, %c0_66, %c0_67] : memref<1x2x8x8xbf16, #tpu.memory_space<vmem>>, vector<1x2x8x8xbf16>
      %87 = vector.shape_cast %86 : vector<1x2x8x8xbf16> to vector<2x8x8xbf16>
      %88 = vector.shape_cast %85 : vector<2x8x8xbf16> to vector<1x2x8x8xbf16>
      tpu.vector_store %arg6[%c0_64, %c0_65, %c0_66, %c0_67], %88 {strides = array<i32>} : memref<1x2x8x8xbf16, #tpu.memory_space<vmem>>, vector<1x2x8x8xbf16>,
    } else {
    }
    return
  }
  func.func @transform_0(%arg0: i32, %arg1: i32, %arg2: i32) -> (i32, i32, i32, i32) {
    %c0_i32 = arith.constant 0 : i32
    %c0_i32_0 = arith.constant 0 : i32
    %c0_i32_1 = arith.constant 0 : i32
    return %arg0, %c0_i32, %arg1, %c0_i32_0 : i32, i32, i32, i32
  }
  func.func @transform_1(%arg0: i32, %arg1: i32, %arg2: i32) -> (i32, i32, i32) {
    %c0_i32 = arith.constant 0 : i32
    %c0_i32_0 = arith.constant 0 : i32
    return %arg0, %arg2, %c0_i32 : i32, i32, i32
  }
  func.func @transform_2(%arg0: i32, %arg1: i32, %arg2: i32) -> (i32, i32, i32) {
    %c0_i32 = arith.constant 0 : i32
    %c0_i32_0 = arith.constant 0 : i32
    return %arg0, %arg2, %c0_i32 : i32, i32, i32
  }
  func.func @transform_3(%arg0: i32, %arg1: i32, %arg2: i32) -> (i32, i32, i32, i32) {
    %c0_i32 = arith.constant 0 : i32
    %c0_i32_0 = arith.constant 0 : i32
    %c0_i32_1 = arith.constant 0 : i32
    return %arg0, %c0_i32, %arg1, %c0_i32_0 : i32, i32, i32, i32
  }
}

module attributes {stable_mosaic.version = 11 : i64} {
  func.func @_rmsnorm_kernel(%arg0: i32, %arg1: memref<16x32xf32, #tpu.memory_space<vmem>>, %arg2: memref<1x32xf32, #tpu.memory_space<vmem>>, %arg3: memref<16x32xf32, #tpu.memory_space<vmem>>) attributes {dimension_semantics = [#tpu.dimension_semantics<parallel>], iteration_bounds = array<i64: 1>, scalar_prefetch = 0 : i64, scratch_operands = 0 : i64, tpu.core_type = #tpu.core_type<tc>, window_params = [{transform_indices = @transform_0, window_bounds = array<i64: 16, 32>}, {pipeline_mode = #tpu.pipeline_mode<synchronous>, transform_indices = @transform_1, window_bounds = array<i64: 1, 32>}, {transform_indices = @transform_2, window_bounds = array<i64: 16, 32>}]} {
    %c0 = arith.constant 0 : index
    %c0_0 = arith.constant 0 : index
    %0 = vector.load %arg1[%c0, %c0_0] : memref<16x32xf32, #tpu.memory_space<vmem>>, vector<16x32xf32>
    %1 = arith.mulf %0, %0 : vector<16x32xf32>
    %cst = arith.constant dense<0.000000e+00> : vector<16xf32>
    %2 = vector.multi_reduction <add>, %1, %cst [1] : vector<16x32xf32> to vector<16xf32>
    %3 = vector.shape_cast %2 : vector<16xf32> to vector<16x1xf32>
    %cst_1 = arith.constant 3.200000e+01 : f32
    %4 = vector.broadcast %cst_1 : f32 to vector<16x1xf32>
    %5 = arith.divf %3, %4 : vector<16x1xf32>
    %cst_2 = arith.constant 9.99999997E-7 : f32
    %6 = vector.broadcast %cst_2 : f32 to vector<16x1xf32>
    %7 = arith.addf %5, %6 : vector<16x1xf32>
    %8 = math.rsqrt %7 : vector<16x1xf32>
    %9 = vector.broadcast %8 : vector<16x1xf32> to vector<16x32xf32>
    %10 = arith.mulf %0, %9 : vector<16x32xf32>
    %c0_3 = arith.constant 0 : index
    %c0_4 = arith.constant 0 : index
    %11 = vector.load %arg2[%c0_3, %c0_4] : memref<1x32xf32, #tpu.memory_space<vmem>>, vector<1x32xf32>
    %12 = vector.broadcast %11 : vector<1x32xf32> to vector<16x32xf32>
    %13 = arith.mulf %10, %12 : vector<16x32xf32>
    %c0_5 = arith.constant 0 : index
    %c0_6 = arith.constant 0 : index
    %14 = vector.load %arg3[%c0_5, %c0_6] : memref<16x32xf32, #tpu.memory_space<vmem>>, vector<16x32xf32>
    tpu.vector_store %arg3[%c0_5, %c0_6], %13 {strides = array<i32>} : memref<16x32xf32, #tpu.memory_space<vmem>>, vector<16x32xf32>,
    return
  }
  func.func @transform_0(%arg0: i32) -> (i32, i32) {
    %c0_i32 = arith.constant 0 : i32
    %c0_i32_0 = arith.constant 0 : i32
    return %arg0, %c0_i32 : i32, i32
  }
  func.func @transform_1(%arg0: i32) -> (i32, i32) {
    %c0_i32 = arith.constant 0 : i32
    %c0_i32_0 = arith.constant 0 : i32
    %c0_i32_1 = arith.constant 0 : i32
    return %c0_i32, %c0_i32_0 : i32, i32
  }
  func.func @transform_2(%arg0: i32) -> (i32, i32) {
    %c0_i32 = arith.constant 0 : i32
    %c0_i32_0 = arith.constant 0 : i32
    return %arg0, %c0_i32 : i32, i32
  }
}

module attributes {stable_mosaic.version = 11 : i64} {
  func.func @_mlp_kernel(%arg0: i32, %arg1: i32, %arg2: memref<16x32xf32, #tpu.memory_space<vmem>>, %arg3: memref<1x32xf32, #tpu.memory_space<vmem>>, %arg4: memref<32x64xbf16, #tpu.memory_space<vmem>>, %arg5: memref<32x64xbf16, #tpu.memory_space<vmem>>, %arg6: memref<64x32xbf16, #tpu.memory_space<vmem>>, %arg7: memref<16x32xf32, #tpu.memory_space<vmem>>, %arg8: memref<16x32xbf16, #tpu.memory_space<vmem>>, %arg9: memref<16x32xf32, #tpu.memory_space<vmem>>) attributes {dimension_semantics = [#tpu.dimension_semantics<parallel>, #tpu.dimension_semantics<arbitrary>], iteration_bounds = array<i64: 1, 1>, scalar_prefetch = 0 : i64, scratch_operands = 2 : i64, tpu.core_type = #tpu.core_type<tc>, window_params = [{transform_indices = @transform_0, window_bounds = array<i64: 16, 32>}, {pipeline_mode = #tpu.pipeline_mode<synchronous>, transform_indices = @transform_1, window_bounds = array<i64: 1, 32>}, {transform_indices = @transform_2, window_bounds = array<i64: 32, 64>}, {transform_indices = @transform_3, window_bounds = array<i64: 32, 64>}, {transform_indices = @transform_4, window_bounds = array<i64: 64, 32>}, {transform_indices = @transform_5, window_bounds = array<i64: 16, 32>}]} {
    %c0_i32 = arith.constant 0 : i32
    %0 = arith.cmpi eq, %arg1, %c0_i32 : i32
    %1 = arith.extui %0 : i1 to i32
    %c0_i32_0 = arith.constant 0 : i32
    %2 = arith.cmpi ne, %1, %c0_i32_0 : i32
    scf.if %2 {
      %c0_17 = arith.constant 0 : index
      %c0_18 = arith.constant 0 : index
      %24 = vector.load %arg2[%c0_17, %c0_18] : memref<16x32xf32, #tpu.memory_space<vmem>>, vector<16x32xf32>
      %25 = arith.mulf %24, %24 : vector<16x32xf32>
      %cst_19 = arith.constant dense<0.000000e+00> : vector<16xf32>
      %26 = vector.multi_reduction <add>, %25, %cst_19 [1] : vector<16x32xf32> to vector<16xf32>
      %27 = vector.shape_cast %26 : vector<16xf32> to vector<16x1xf32>
      %cst_20 = arith.constant 3.200000e+01 : f32
      %28 = vector.broadcast %cst_20 : f32 to vector<16x1xf32>
      %29 = arith.divf %27, %28 : vector<16x1xf32>
      %cst_21 = arith.constant 9.99999997E-7 : f32
      %30 = vector.broadcast %cst_21 : f32 to vector<16x1xf32>
      %31 = arith.addf %29, %30 : vector<16x1xf32>
      %32 = math.rsqrt %31 : vector<16x1xf32>
      %33 = vector.broadcast %32 : vector<16x1xf32> to vector<16x32xf32>
      %34 = arith.mulf %24, %33 : vector<16x32xf32>
      %c0_22 = arith.constant 0 : index
      %c0_23 = arith.constant 0 : index
      %35 = vector.load %arg3[%c0_22, %c0_23] : memref<1x32xf32, #tpu.memory_space<vmem>>, vector<1x32xf32>
      %36 = vector.broadcast %35 : vector<1x32xf32> to vector<16x32xf32>
      %37 = arith.mulf %34, %36 : vector<16x32xf32>
      %38 = arith.truncf %37 : vector<16x32xf32> to vector<16x32xbf16>
      %c0_24 = arith.constant 0 : index
      %c0_25 = arith.constant 0 : index
      %39 = vector.load %arg8[%c0_24, %c0_25] : memref<16x32xbf16, #tpu.memory_space<vmem>>, vector<16x32xbf16>
      tpu.vector_store %arg8[%c0_24, %c0_25], %38 {strides = array<i32>} : memref<16x32xbf16, #tpu.memory_space<vmem>>, vector<16x32xbf16>,
      %cst_26 = arith.constant 0.000000e+00 : f32
      %40 = vector.broadcast %cst_26 : f32 to vector<16x32xf32>
      %c0_27 = arith.constant 0 : index
      %c0_28 = arith.constant 0 : index
      %41 = vector.load %arg9[%c0_27, %c0_28] : memref<16x32xf32, #tpu.memory_space<vmem>>, vector<16x32xf32>
      tpu.vector_store %arg9[%c0_27, %c0_28], %40 {strides = array<i32>} : memref<16x32xf32, #tpu.memory_space<vmem>>, vector<16x32xf32>,
    } else {
    }
    %c0 = arith.constant 0 : index
    %c0_1 = arith.constant 0 : index
    %3 = vector.load %arg8[%c0, %c0_1] : memref<16x32xbf16, #tpu.memory_space<vmem>>, vector<16x32xbf16>
    %c0_2 = arith.constant 0 : index
    %c0_3 = arith.constant 0 : index
    %4 = vector.load %arg4[%c0_2, %c0_3] : memref<32x64xbf16, #tpu.memory_space<vmem>>, vector<32x64xbf16>
    %cst = arith.constant dense<0.000000e+00> : vector<16x64xf32>
    %5 = tpu.matmul %3, %4, %cst {dimension_numbers = #tpu.dot_dimension_numbers<[1], [0], [0], [1], [0, 0, 1, 1], [], []>} : vector<16x32xbf16>, vector<32x64xbf16>, vector<16x64xf32> -> vector<16x64xf32>
    %c0_4 = arith.constant 0 : index
    %c0_5 = arith.constant 0 : index
    %6 = vector.load %arg5[%c0_4, %c0_5] : memref<32x64xbf16, #tpu.memory_space<vmem>>, vector<32x64xbf16>
    %cst_6 = arith.constant dense<0.000000e+00> : vector<16x64xf32>
    %7 = tpu.matmul %3, %6, %cst_6 {dimension_numbers = #tpu.dot_dimension_numbers<[1], [0], [0], [1], [0, 0, 1, 1], [], []>} : vector<16x32xbf16>, vector<32x64xbf16>, vector<16x64xf32> -> vector<16x64xf32>
    %8 = arith.negf %5 : vector<16x64xf32>
    %9 = math.exp %8 : vector<16x64xf32>
    %cst_7 = arith.constant 1.000000e+00 : f32
    %10 = vector.broadcast %cst_7 : f32 to vector<16x64xf32>
    %11 = arith.addf %10, %9 : vector<16x64xf32>
    %12 = arith.divf %10, %11 : vector<16x64xf32>
    %13 = arith.mulf %5, %12 : vector<16x64xf32>
    %14 = arith.mulf %13, %7 : vector<16x64xf32>
    %c0_8 = arith.constant 0 : index
    %c0_9 = arith.constant 0 : index
    %15 = vector.load %arg9[%c0_8, %c0_9] : memref<16x32xf32, #tpu.memory_space<vmem>>, vector<16x32xf32>
    %16 = arith.truncf %14 : vector<16x64xf32> to vector<16x64xbf16>
    %c0_10 = arith.constant 0 : index
    %c0_11 = arith.constant 0 : index
    %17 = vector.load %arg6[%c0_10, %c0_11] : memref<64x32xbf16, #tpu.memory_space<vmem>>, vector<64x32xbf16>
    %cst_12 = arith.constant dense<0.000000e+00> : vector<16x32xf32>
    %18 = tpu.matmul %16, %17, %cst_12 {dimension_numbers = #tpu.dot_dimension_numbers<[1], [0], [0], [1], [0, 0, 1, 1], [], []>} : vector<16x64xbf16>, vector<64x32xbf16>, vector<16x32xf32> -> vector<16x32xf32>
    %19 = arith.addf %15, %18 : vector<16x32xf32>
    %c0_13 = arith.constant 0 : index
    %c0_14 = arith.constant 0 : index
    %20 = vector.load %arg9[%c0_13, %c0_14] : memref<16x32xf32, #tpu.memory_space<vmem>>, vector<16x32xf32>
    tpu.vector_store %arg9[%c0_13, %c0_14], %19 {strides = array<i32>} : memref<16x32xf32, #tpu.memory_space<vmem>>, vector<16x32xf32>,
    %c0_i32_15 = arith.constant 0 : i32
    %21 = arith.cmpi eq, %arg1, %c0_i32_15 : i32
    %22 = arith.extui %21 : i1 to i32
    %c0_i32_16 = arith.constant 0 : i32
    %23 = arith.cmpi ne, %22, %c0_i32_16 : i32
    scf.if %23 {
      %c0_17 = arith.constant 0 : index
      %c0_18 = arith.constant 0 : index
      %24 = vector.load %arg2[%c0_17, %c0_18] : memref<16x32xf32, #tpu.memory_space<vmem>>, vector<16x32xf32>
      %c0_19 = arith.constant 0 : index
      %c0_20 = arith.constant 0 : index
      %25 = vector.load %arg9[%c0_19, %c0_20] : memref<16x32xf32, #tpu.memory_space<vmem>>, vector<16x32xf32>
      %26 = arith.addf %24, %25 : vector<16x32xf32>
      %c0_21 = arith.constant 0 : index
      %c0_22 = arith.constant 0 : index
      %27 = vector.load %arg7[%c0_21, %c0_22] : memref<16x32xf32, #tpu.memory_space<vmem>>, vector<16x32xf32>
      tpu.vector_store %arg7[%c0_21, %c0_22], %26 {strides = array<i32>} : memref<16x32xf32, #tpu.memory_space<vmem>>, vector<16x32xf32>,
    } else {
    }
    return
  }
  func.func @transform_0(%arg0: i32, %arg1: i32) -> (i32, i32) {
    %c0_i32 = arith.constant 0 : i32
    %c0_i32_0 = arith.constant 0 : i32
    return %arg0, %c0_i32 : i32, i32
  }
  func.func @transform_1(%arg0: i32, %arg1: i32) -> (i32, i32) {
    %c0_i32 = arith.constant 0 : i32
    %c0_i32_0 = arith.constant 0 : i32
    %c0_i32_1 = arith.constant 0 : i32
    return %c0_i32, %c0_i32_0 : i32, i32
  }
  func.func @transform_2(%arg0: i32, %arg1: i32) -> (i32, i32) {
    %c0_i32 = arith.constant 0 : i32
    %c0_i32_0 = arith.constant 0 : i32
    return %c0_i32, %arg1 : i32, i32
  }
  func.func @transform_3(%arg0: i32, %arg1: i32) -> (i32, i32) {
    %c0_i32 = arith.constant 0 : i32
    %c0_i32_0 = arith.constant 0 : i32
    return %c0_i32, %arg1 : i32, i32
  }
  func.func @transform_4(%arg0: i32, %arg1: i32) -> (i32, i32) {
    %c0_i32 = arith.constant 0 : i32
    %c0_i32_0 = arith.constant 0 : i32
    return %arg1, %c0_i32 : i32, i32
  }
  func.func @transform_5(%arg0: i32, %arg1: i32) -> (i32, i32) {
    %c0_i32 = arith.constant 0 : i32
    %c0_i32_0 = arith.constant 0 : i32
    return %arg0, %c0_i32 : i32, i32
  }
}

</mosaic_0001>

<bundles_post_ra>
// kernel: transformer_forward.11
= control target key start
LH: loop header
LB: loop body
LE: loop exit
PB: predicated region body
PF: predicated region fallthrough
CT: control target
= control target key end

     0   :  { %vm19_vm0 = vcmask 261120   ;;  %v131_v0 = vmov 0.0   ;;  %vm132_vm1 = vmmov 0   ;;  %s181_s1 = inlined_call_operand.vmem [shape: bf16[32,32], index: 1, kind: input, shape index: {}]   ;;  %s182_s0 = inlined_call_operand.vmem [shape: bf16[16,32], index: 0, kind: input, shape index: {}]   ;;  %s183_s2 = inlined_call_operand.vmem [shape: f32[16,32], index: 2, kind: input, shape index: {}, may-alias: {2,3}]   ;;  %s184_s3 = inlined_call_operand.vmem [shape: f32[16,32], index: 3, kind: output, shape index: {}, may-alias: {2,3}]  }
   0x1   :  { %118 = vmatprep.subr.bf16.mxu0 %v131_v0  ;;  %v128_v1 = vld [vmem:[%s181_s1 + $0x8] sm:$0xff]   ;;  %122 = vmatprep.mubr.msk.bf16.mxu0 %vm132_vm1, %v131_v0  ;;  %20 = vst.msk [vmem:[#allocation2] sm:$0xff] %vm19_vm0, %v131_v0  ;;  %21 = vst.msk [vmem:[#allocation2 + $0x8] sm:$0xff] %vm19_vm0, %v131_v0  ;;  %v129_v2 = vld [vmem:[%s181_s1] sm:$0xff]  }
   0x2   :  { %119 = vmatpush3.bf16.msra.mxu0 %v128_v1  ;;  %v130_v3 = vld [vmem:[%s182_s0] sm:$0xff]   ;;  %v100_v15 = vld [vmem:[%s183_s2 + $0x8] sm:$0xff] }
   0x3   :  { %120 = vmatprep.subr.bf16.mxu0 %v131_v0  ;;  %v99_v12 = vld [vmem:[%s183_s2] sm:$0xff] }
   0x6   :  { %121 = vmatpush3.bf16.msra.mxu0 %v129_v2 }
   0x8   :  { %v22_v4 = vld [vmem:[#allocation2] sm:$0xff]  ;;  %v23_v8 = vld [vmem:[#allocation2 + $0x8] sm:$0xff] }
   0x9   :  { %123 = vmatmul.mubr.msk.bf16.vlgmr.msra.gmra.mxu0 %vm19_vm0, %v130_v3 }
  0xc9   :  { %v85_v5 = vpop.f32.mrf.mxu0 }
  0xca   :  { %v92_v6 = vadd.f32 %v85_v5, %v22_v4 }
  0xcb   :  { %v124_v7 = vpop.f32.mrf.mxu0 }
  0xcc   :  { %94 = vst.msk [vmem:[#allocation2] sm:$0xff] %vm19_vm0, %v92_v6 }
  0xcd   :  { %v88_v9 = vpop.f32.mrf.mxu0 }
  0xce   :  { %v93_v10 = vadd.f32 %v88_v9, %v23_v8 }
  0xcf   :  { %v125_v11 = vpop.f32.mrf.mxu0 }
  0xd0   :  { %95 = vst.msk [vmem:[#allocation2 + $0x8] sm:$0xff] %vm19_vm0, %v93_v10 }
  0xd3   :  { %v101_v13 = vld [vmem:[#allocation2] sm:$0xff] }
  0xd4   :  { %v103_v14 = vadd.f32 %v101_v13, %v99_v12 }
  0xd6   :  { %105 = vst.msk [vmem:[%s184_s3] sm:$0xff] %vm19_vm0, %v103_v14 }
  0xd7   :  { %v102_v16 = vld [vmem:[#allocation2 + $0x8] sm:$0xff] }
  0xd8   :  { %v104_v17 = vadd.f32 %v102_v16, %v100_v15 }
  0xda   :  { %106 = vst.msk [vmem:[%s184_s3 + $0x8] sm:$0xff] %vm19_vm0, %v104_v17 }

// kernel: transformer_forward.9
= control target key start
LH: loop header
LB: loop body
LE: loop exit
PB: predicated region body
PF: predicated region fallthrough
CT: control target
= control target key end

     0   :  { %vm28_vm0 = vcmask 261120   ;;  %v459_v6 = vmov 0.0   ;;  %vm460_vm1 = vmmov 0   ;;  %s462_s10 = smov 100   ;;  %s464_s11 = smov 84   ;;  %vm136_vm2 = vcmask 31744   ;;  %s679_s0 = inlined_call_operand.vmem [shape: f32[16,32], index: 0, kind: input, shape index: {}]   ;;  %s680_s2 = inlined_call_operand.vmem [shape: bf16[32,64], index: 2, kind: input, shape index: {}]   ;;  %s681_s1 = inlined_call_operand.vmem [shape: f32[1,32], index: 1, kind: input, shape index: {}]   ;;  %s682_s3 = inlined_call_operand.vmem [shape: f32[16,8], index: 3, kind: input, shape index: {}]   ;;  %s683_s4 = inlined_call_operand.vmem [shape: f32[16,8], index: 4, kind: input, shape index: {}]   ;;  %s684_s5 = inlined_call_operand.vmem [shape: bf16[16,32], index: 5, kind: output, shape index: {0}]   ;;  %s685_s7 = inlined_call_operand.vmem [shape: bf16[16,16], index: 7, kind: output, shape index: {2}]   ;;  %s686_s6 = inlined_call_operand.vmem [shape: bf16[16,16], index: 6, kind: output, shape index: {1}]  }
   0x1   :  { %v24_v0 = vld [vmem:[%s679_s0] sm:$0xff]  ;;  %v25_v1 = vld [vmem:[%s679_s0 + $0x8] sm:$0xff]  ;;  %419 = vmatprep.subr.bf16.mxu0 %v459_v6  ;;  %423 = vmatprep.mubr.msk.bf16.mxu0 %vm460_vm1, %v459_v6  ;;  %s465_s12 = smov 116   ;;  %s466_s13 = smov 108   ;;  %vm257_vm3 = vcmask 64512   ;;  %vm260_vm4 = vcmask 130048  }
   0x2   :  { %v26_v2 = vmul.f32 %v24_v0, %v24_v0  ;;  %v27_v3 = vmul.f32 %v25_v1, %v25_v1  ;;  %v453_v7 = vld [vmem:[%s680_s2 + $0x8] sm:$0xff]   ;;  %v454_v8 = vld [vmem:[%s680_s2] sm:$0xff]   ;;  %s461_s2 = smov 92   ;;  %s467_s16 = smov 32   ;;  %vm263_vm5 = vcmask 195584   ;;  %vm274_vm6 = vcmask 257024  }
   0x3   :  { %420 = vmatpush3.bf16.msra.mxu0 %v453_v7  ;;  %v400_v18 = vld [vmem:[%s681_s1] ss:$0 sm:$0xff]  ;;  %s463_s1 = smov 124   ;;  %v551_v29 = vld [vmem:[%s682_s3 + $0x8] sm:$0xff]  ;;  %s468_s17 = smov 40   ;;  %vm371_vm7 = vcmask 125952  }
   0x4   :  { %v29_v4 = vsel %vm28_vm0, %v26_v2, 0.0  ;;  %v32_v5 = vsel %vm28_vm0, %v27_v3, 0.0  ;;  %421 = vmatprep.subr.bf16.mxu0 %v459_v6  ;;  %v567_v30 = vld [vmem:[%s682_s3] sm:$0xff]  ;;  %v587_v42 = vld [vmem:[%s683_s4 + $0x8] sm:$0xff]  ;;  %s469_s23 = smov 4   ;;  %s470_s24 = smov 8  }
   0x5   :  { %30 = vadd.xlane.f32.xlu0 %v29_v4  ;;  %v576_v32 = vld [vmem:[%s683_s4] sm:$0xff]  ;;  %s471_s4 = smov 16   ;;  %s472_s25 = smov 24  }
   0x6   :  { %s473_s26 = smov 96   ;;  %s474_s27 = smov 80  }
   0x7   :  { %422 = vmatpush3.bf16.msra.mxu0 %v454_v8 }
   0x9   :  { %33 = vadd.xlane.f32.xlu0 %v32_v5 }
  0x8e   :  { %v31_v9 = vpop.xlane.xlu0 %30 }
  0x8f   :  { %v36_v10 = vmul.f32 0.03125, %v31_v9 }
  0x91   :  { %v38_v11 = vadd.f32 1e-06, %v36_v10 }
  0x92   :  { %v34_v12 = vpop.xlane.xlu0 %33 }
  0x93   :  { %455 = vrsqrt.f32 %v38_v11  ;;  %v37_v13 = vmul.f32 0.03125, %v34_v12 }
  0x95   :  { %v39_v14 = vadd.f32 1e-06, %v37_v13 }
  0x97   :  { %457 = vrsqrt.f32 %v39_v14 }
  0xa0   :  { %v456_v15 = vpop.eup %455 }
  0xa1   :  { %v42_v16 = vmul.f32 %v456_v15, %v24_v0 }
  0xa3   :  { %v51_v20 = vmul.f32 %v400_v18, %v42_v16 }
  0xa4   :  { %v458_v17 = vpop.eup %457 }
  0xa5   :  { %v43_v19 = vmul.f32 %v458_v17, %v25_v1 }
  0xa7   :  { %v52_v21 = vmul.f32 %v400_v18, %v43_v19 }
  0xa9   :  { %v53_v22 = vpack.c.bf16 %v52_v21, %v51_v20 }
  0xab   :  { %424 = vmatmul.mubr.msk.bf16.vlgmr.msra.gmra.mxu0 %vm28_vm0, %v53_v22 }
 0x16b   :  { %v533_v23 = vpop.f32.mrf.mxu0 }
 0x16c   :  { %317 = vrot.lane.b32.xlu1 %v533_v23, %s461_s2  ;;  %283 = vrot.lane.b32.xlu0 %v533_v23, %s462_s10  ;;  %v118_v25 = vsub.f32 0.0, %v533_v23 }
 0x16d   :  { %v425_v24 = vpop.f32.mrf.mxu0 }
 0x16f   :  { %v539_v26 = vpop.f32.mrf.mxu0 }
 0x170   :  { %277 = vrot.lane.b32.xlu1 %v118_v25, %s461_s2  ;;  %155 = vrot.lane.b32.xlu0 %v539_v26, %s463_s1  ;;  %v119_v28 = vsub.f32 0.0, %v539_v26 }
 0x171   :  { %v426_v27 = vpop.f32.mrf.mxu0 }
 0x174   :  { %311 = vrot.lane.b32.xlu1 %v118_v25, %s464_s11  ;;  %193 = vrot.lane.b32.xlu0 %v539_v26, %s465_s12 }
 0x178   :  { %229 = vrot.lane.b32.xlu0 %v539_v26, %s466_s13  ;;  %285 = vrot.lane.b32.xlu1 %v539_v26, %s462_s10 }
 0x17c   :  { %293 = vrot.lane.b32.xlu0 %v551_v29, %s467_s16  ;;  %279 = vrot.lane.b32.xlu1 %v119_v28, %s461_s2 }
 0x180   :  { %327 = vrot.lane.b32.xlu0 %v551_v29, %s468_s17  ;;  %313 = vrot.lane.b32.xlu1 %v119_v28, %s464_s11 }
 0x184   :  { %149 = vrot.lane.b32.xlu0 %v119_v28, %s465_s12  ;;  %319 = vrot.lane.b32.xlu1 %v539_v26, %s461_s2 }
 0x188   :  { %187 = vrot.lane.b32.xlu0 %v119_v28, %s466_s13  ;;  %147 = vrot.lane.b32.xlu1 %v118_v25, %s465_s12 }
 0x18c   :  { %223 = vrot.lane.b32.xlu0 %v119_v28, %s462_s10  ;;  %153 = vrot.lane.b32.xlu1 %v533_v23, %s463_s1 }
 0x190   :  { %185 = vrot.lane.b32.xlu1 %v118_v25, %s466_s13 }
 0x194   :  { %191 = vrot.lane.b32.xlu1 %v533_v23, %s465_s12 }
 0x198   :  { %221 = vrot.lane.b32.xlu1 %v118_v25, %s462_s10 }
 0x19c   :  { %227 = vrot.lane.b32.xlu1 %v533_v23, %s466_s13 }
 0x1a0   :  { %291 = vrot.lane.b32.xlu1 %v567_v30, %s467_s16 }
 0x1a4   :  { %325 = vrot.lane.b32.xlu1 %v567_v30, %s468_s17 }
 0x1de   :  { %v318_v31 = vpop.permute.xlu1 %317  ;;  %v284_v33 = vpop.permute.xlu0 %283 }
 0x1e2   :  { %v278_v34 = vpop.permute.xlu1 %277  ;;  %v156_v39 = vpop.permute.xlu0 %155 }
 0x1e3   :  { %v289_v35 = vsel %vm136_vm2, %v278_v34, %v284_v33 }
 0x1e4   :  { %v299_v36 = vmul.f32 %v289_v35, %v576_v32 }
 0x1e6   :  { %v312_v37 = vpop.permute.xlu1 %311  ;;  %303 = vrot.lane.b32.xlu1 %v299_v36, %s467_s16  ;;  %v194_v43 = vpop.permute.xlu0 %193 }
 0x1e7   :  { %v323_v38 = vsel %vm136_vm2, %v312_v37, %v318_v31 }
 0x1e8   :  { %v333_v40 = vmul.f32 %v323_v38, %v576_v32  ;;  %v415_v38 = vpack.c.bf16 %v539_v26, %v539_v26 }
 0x1ea   :  { %v286_v41 = vpop.permute.xlu1 %285  ;;  %337 = vrot.lane.b32.xlu1 %v333_v40, %s468_s17  ;;  %v230_v48 = vpop.permute.xlu0 %229 }
 0x1ee   :  { %122 = vrot.lane.b32.xlu1 %v118_v25, %s463_s1  ;;  %v280_v44 = vpop.permute.xlu1 %279  ;;  %v294_v52 = vpop.permute.xlu0 %293 }
 0x1ef   :  { %v290_v45 = vsel %vm136_vm2, %v280_v44, %v286_v41  ;;  %v298_v16 = vmul.f32 %v294_v52, %v539_v26 }
 0x1f0   :  { %v300_v46 = vmul.f32 %v290_v45, %v587_v42 }
 0x1f2   :  { %130 = vrot.lane.b32.xlu1 %v533_v23, %s469_s23  ;;  %305 = vrot.lane.b32.xlu0 %v300_v46, %s467_s16  ;;  %v314_v47 = vpop.permute.xlu1 %313  ;;  %v328_v56 = vpop.permute.xlu0 %327 }
 0x1f3   :  { %v332_v25 = vmul.f32 %v328_v56, %v539_v26 }
 0x1f6   :  { %163 = vrot.lane.b32.xlu1 %v567_v30, %s470_s24  ;;  %v320_v49 = vpop.permute.xlu1 %319  ;;  %v150_v59 = vpop.permute.xlu0 %149 }
 0x1f7   :  { %v324_v50 = vsel %vm136_vm2, %v314_v47, %v320_v49  ;;  %v160_v1 = vsel %vm136_vm2, %v150_v59, %v156_v39 }
 0x1f8   :  { %v334_v51 = vmul.f32 %v324_v50, %v587_v42  ;;  %v172_v4 = vmul.f32 %v160_v1, %v587_v42  ;;  %v139_v50 = vmul.f32 %v567_v30, %v533_v23 }
 0x1fa   :  { %199 = vrot.lane.b32.xlu1 %v567_v30, %s471_s4  ;;  %339 = vrot.lane.b32.xlu0 %v334_v51, %s468_s17  ;;  %v148_v53 = vpop.permute.xlu1 %147  ;;  %v188_v0 = vpop.permute.xlu0 %187 }
 0x1fb   :  { %v198_v6 = vsel %vm136_vm2, %v188_v0, %v194_v43 }
 0x1fc   :  { %v208_v8 = vmul.f32 %v198_v6, %v587_v42 }
 0x1fe   :  { %124 = vrot.lane.b32.xlu0 %v119_v28, %s463_s1  ;;  %v154_v54 = vpop.permute.xlu1 %153  ;;  %v224_v7 = vpop.permute.xlu0 %223  ;;  %v414_v28 = vpack.c.bf16 %v533_v23, %v533_v23 }
 0x1ff   :  { %v159_v55 = vsel %vm136_vm2, %v148_v53, %v154_v54  ;;  %v234_v9 = vsel %vm136_vm2, %v224_v7, %v230_v48 }
 0x200   :  { %v171_v57 = vmul.f32 %v159_v55, %v576_v32  ;;  %v244_v10 = vmul.f32 %v234_v9, %v587_v42 }
 0x202   :  { %132 = vrot.lane.b32.xlu0 %v539_v26, %s469_s23  ;;  %175 = vrot.lane.b32.xlu1 %v171_v57, %s470_s24  ;;  %v186_v58 = vpop.permute.xlu1 %185 }
 0x206   :  { %165 = vrot.lane.b32.xlu0 %v551_v29, %s470_s24  ;;  %235 = vrot.lane.b32.xlu1 %v567_v30, %s472_s25  ;;  %v192_v60 = vpop.permute.xlu1 %191 }
 0x207   :  { %v197_v61 = vsel %vm136_vm2, %v186_v58, %v192_v60 }
 0x208   :  { %v207_v62 = vmul.f32 %v197_v61, %v576_v32 }
 0x20a   :  { %201 = vrot.lane.b32.xlu0 %v551_v29, %s471_s4  ;;  %211 = vrot.lane.b32.xlu1 %v207_v62, %s471_s4  ;;  %v222_v63 = vpop.permute.xlu1 %221 }
 0x20e   :  { %237 = vrot.lane.b32.xlu0 %v551_v29, %s472_s25  ;;  %v228_v2 = vpop.permute.xlu1 %227 }
 0x20f   :  { %v233_v3 = vsel %vm136_vm2, %v222_v63, %v228_v2  ;;  %v140_v63 = vmul.f32 %v551_v29, %v539_v26 }
 0x210   :  { %v243_v5 = vmul.f32 %v233_v3, %v576_v32 }
 0x212   :  { %177 = vrot.lane.b32.xlu0 %v172_v4, %s470_s24  ;;  %247 = vrot.lane.b32.xlu1 %v243_v5, %s472_s25  ;;  %v292_v11 = vpop.permute.xlu1 %291 }
 0x213   :  { %v297_v17 = vmul.f32 %v292_v11, %v533_v23 }
 0x216   :  { %213 = vrot.lane.b32.xlu0 %v208_v8, %s471_s4  ;;  %v326_v12 = vpop.permute.xlu1 %325 }
 0x217   :  { %v331_v27 = vmul.f32 %v326_v12, %v533_v23 }
 0x21a   :  { %249 = vrot.lane.b32.xlu0 %v244_v10, %s472_s25 }
 0x258   :  { %v304_v13 = vpop.permute.xlu1 %303 }
 0x259   :  { %v309_v20 = vadd.f32 %v304_v13, %v297_v17 }
 0x25c   :  { %v338_v14 = vpop.permute.xlu1 %337 }
 0x25d   :  { %v343_v33 = vadd.f32 %v338_v14, %v331_v27 }
 0x260   :  { %v123_v15 = vpop.permute.xlu1 %122 }
 0x264   :  { %v306_v18 = vpop.permute.xlu0 %305  ;;  %v131_v19 = vpop.permute.xlu1 %130 }
 0x265   :  { %v310_v21 = vadd.f32 %v306_v18, %v298_v16  ;;  %v137_v44 = vsel %vm136_vm2, %v123_v15, %v131_v19 }
 0x266   :  { %v141_v46 = vmul.f32 %v137_v44, %v576_v32 }
 0x267   :  { %v443_v22 = vpack.i.bf16 %v310_v21, %v309_v20 }
 0x268   :  { %v164_v24 = vpop.permute.xlu1 %163  ;;  %v143_v54 = vadd.f32 %v141_v46, %v139_v50 }
 0x269   :  { %444 = vrot.lane.b32.xlu1 %v443_v22, %s473_s26  ;;  %v169_v47 = vmul.f32 %v164_v24, %v533_v23 }
 0x26a   :  { %v145_v60 = vmul.f32 0.35355338, %v143_v54 }
 0x26c   :  { %v340_v31 = vpop.permute.xlu0 %339  ;;  %v200_v36 = vpop.permute.xlu1 %199 }
 0x26d   :  { %v344_v34 = vadd.f32 %v340_v31, %v332_v25  ;;  %380 = vrot.lane.b32.xlu1 %v414_v28, %s474_s27  ;;  %v205_v49 = vmul.f32 %v200_v36, %v533_v23 }
 0x26f   :  { %v448_v35 = vpack.i.bf16 %v344_v34, %v343_v33 }
 0x270   :  { %v125_v37 = vpop.permute.xlu0 %124 }
 0x271   :  { %449 = vrot.lane.b32.xlu0 %v448_v35, %s473_s26 }
 0x274   :  { %v133_v39 = vpop.permute.xlu0 %132  ;;  %v176_v40 = vpop.permute.xlu1 %175 }
 0x275   :  { %382 = vrot.lane.b32.xlu0 %v415_v38, %s474_s27  ;;  %v181_v51 = vadd.f32 %v176_v40, %v169_v47  ;;  %v138_v55 = vsel %vm136_vm2, %v125_v37, %v133_v39 }
 0x276   :  { %v142_v61 = vmul.f32 %v138_v55, %v587_v42 }
 0x277   :  { %v183_v56 = vmul.f32 0.35355338, %v181_v51 }
 0x278   :  { %v166_v41 = vpop.permute.xlu0 %165  ;;  %v236_v43 = vpop.permute.xlu1 %235  ;;  %v144_v5 = vadd.f32 %v142_v61, %v140_v63 }
 0x279   :  { %v241_v57 = vmul.f32 %v236_v43, %v533_v23  ;;  %v170_v62 = vmul.f32 %v166_v41, %v539_v26  ;;  %v258_v0 = vsel %vm257_vm3, %v145_v60, %v183_v56 }
 0x27a   :  { %v146_v11 = vmul.f32 0.35355338, %v144_v5 }
 0x27c   :  { %v202_v45 = vpop.permute.xlu0 %201  ;;  %v212_v48 = vpop.permute.xlu1 %211 }
 0x27d   :  { %v217_v52 = vadd.f32 %v212_v48, %v205_v49  ;;  %v206_v1 = vmul.f32 %v202_v45, %v539_v26 }
 0x27f   :  { %v219_v32 = vmul.f32 0.35355338, %v217_v52 }
 0x280   :  { %v238_v53 = vpop.permute.xlu0 %237 }
 0x281   :  { %v261_v3 = vsel %vm260_vm4, %v258_v0, %v219_v32  ;;  %v242_v8 = vmul.f32 %v238_v53, %v539_v26 }
 0x284   :  { %v178_v58 = vpop.permute.xlu0 %177  ;;  %v248_v59 = vpop.permute.xlu1 %247 }
 0x285   :  { %v253_v30 = vadd.f32 %v248_v59, %v241_v57  ;;  %v182_v23 = vadd.f32 %v178_v58, %v170_v62 }
 0x287   :  { %v255_v2 = vmul.f32 0.35355338, %v253_v30  ;;  %v184_v9 = vmul.f32 0.35355338, %v182_v23 }
 0x288   :  { %v214_v4 = vpop.permute.xlu0 %213 }
 0x289   :  { %v264_v42 = vsel %vm263_vm5, %v261_v3, %v255_v2  ;;  %v218_v6 = vadd.f32 %v214_v4, %v206_v1  ;;  %v259_v13 = vsel %vm257_vm3, %v146_v11, %v184_v9 }
 0x28a   :  { %v410_v7 = vpack.c.bf16 %v264_v42, %v264_v42 }
 0x28b   :  { %v220_v29 = vmul.f32 0.35355338, %v218_v6 }
 0x28c   :  { %275 = vst.msk [vmem:[%s684_s5] sm:$0xf] %vm274_vm6, %v410_v7  ;;  %v250_v10 = vpop.permute.xlu0 %249 }
 0x28d   :  { %v254_v12 = vadd.f32 %v250_v10, %v242_v8  ;;  %v262_v15 = vsel %vm260_vm4, %v259_v13, %v220_v29 }
 0x28f   :  { %v256_v14 = vmul.f32 0.35355338, %v254_v12 }
 0x291   :  { %v265_v16 = vsel %vm263_vm5, %v262_v15, %v256_v14 }
 0x292   :  { %v411_v17 = vpack.c.bf16 %v265_v16, %v265_v16 }
 0x294   :  { %276 = vst.msk [vmem:[%s684_s5 + $0x4] sm:$0xf] %vm274_vm6, %v411_v17 }
 0x2db   :  { %v445_v26 = vpop.permute.xlu1 %444 }
 0x2dc   :  { %v447_v20 = vunpack.i.h.bf16 %v445_v26  ;;  %v446_v21 = vunpack.i.l.bf16 %v445_v26 }
 0x2df   :  { %v381_v18 = vpop.permute.xlu1 %380 }
 0x2e0   :  { %386 = vst.msk [vmem:[%s685_s7] sm:$0xf] %vm371_vm7, %v381_v18 }
 0x2e3   :  { %v450_v19 = vpop.permute.xlu0 %449 }
 0x2e4   :  { %v452_v22 = vunpack.i.h.bf16 %v450_v19  ;;  %v451_v24 = vunpack.i.l.bf16 %v450_v19 }
 0x2e6   :  { %v361_v25 = vsel %vm257_vm3, %v446_v21, %v451_v24  ;;  %v362_v27 = vsel %vm257_vm3, %v447_v20, %v452_v22 }
 0x2e7   :  { %v412_v28 = vpack.c.bf16 %v361_v25, %v361_v25  ;;  %v413_v31 = vpack.c.bf16 %v362_v27, %v362_v27  ;;  %v383_v33 = vpop.permute.xlu0 %382 }
 0x2e8   :  { %387 = vst.msk [vmem:[%s685_s7 + $0x4] sm:$0xf] %vm371_vm7, %v383_v33 }
 0x2e9   :  { %372 = vst.msk [vmem:[%s686_s6] sm:$0xf] %vm371_vm7, %v412_v28  ;;  %373 = vst.msk [vmem:[%s686_s6 + $0x4] sm:$0xf] %vm371_vm7, %v413_v31 }

// kernel: transformer_forward.17
= control target key start
LH: loop header
LB: loop body
LE: loop exit
PB: predicated region body
PF: predicated region fallthrough
CT: control target
= control target key end

     0   :  { %vm16_vm0 = vcmask 261120   ;;  %s123_s0 = inlined_call_operand.vmem [shape: f32[16,32], index: 0, kind: input, shape index: {}]   ;;  %s124_s1 = inlined_call_operand.vmem [shape: f32[1,32], index: 1, kind: input, shape index: {}]   ;;  %s125_s2 = inlined_call_operand.hbm [shape: f32[16,32], index: 2, kind: output, shape index: {}]  }
   0x1   :  { %v12_v0 = vld [vmem:[%s123_s0] sm:$0xff]  ;;  %v13_v1 = vld [vmem:[%s123_s0 + $0x8] sm:$0xff] }
   0x2   :  { %7 = vsyncpa [#allocation3], 0  ;;  %v14_v2 = vmul.f32 %v12_v0, %v12_v0  ;;  %v15_v3 = vmul.f32 %v13_v1, %v13_v1  ;;  %v59_v13 = vld [vmem:[%s124_s1] ss:$0 sm:$0xff]  ;;  %s89_s14 = smov [#allocation2]  }
   0x3   :  { %s48_s15 = sshll.u32 %s89_s14, 4  ;;  %s49_s15 = int_to_ptr.vmem [resolvable:$true] %s48_s15 }
   0x4   :  { %v17_v4 = vsel %vm16_vm0, %v14_v2, 0.0  ;;  %v20_v5 = vsel %vm16_vm0, %v15_v3, 0.0  ;;  %s67_s16 = scalar_lea.vmem %s49_s15, 256  ;;  %p72_p1 = scmp.lt.s32.totalorder %s49_s15, %s49_s15 }
   0x5   :  { %18 = vadd.xlane.f32.xlu0 %v17_v4  ;;  %p68_p0 = scmp.ne.s32.totalorder %s49_s15, %s67_s16  ;;  %p73_p2 = scmp.lt.s32.totalorder %s67_s16, %s67_s16 }
   0x7   :  { %p74_p3 = por %p73_p2, %p72_p1 }
   0x9   :  { %21 = vadd.xlane.f32.xlu0 %v20_v5  ;;  %p75_p4 = pnand %p74_p3, %p68_p0 }
  0x8e   :  { %v19_v6 = vpop.xlane.xlu0 %18 }
  0x8f   :  { %v24_v7 = vmul.f32 0.03125, %v19_v6 }
  0x91   :  { %v26_v8 = vadd.f32 1e-06, %v24_v7 }
  0x92   :  { %v22_v9 = vpop.xlane.xlu0 %21 }
  0x93   :  { %63 = vrsqrt.f32 %v26_v8  ;;  %v25_v10 = vmul.f32 0.03125, %v22_v9 }
  0x95   :  { %v27_v11 = vadd.f32 1e-06, %v25_v10 }
  0x97   :  { %65 = vrsqrt.f32 %v27_v11 }
  0xa0   :  { %v64_v12 = vpop.eup %63 }
  0xa1   :  { %v30_v14 = vmul.f32 %v64_v12, %v12_v0 }
  0xa3   :  { %v39_v15 = vmul.f32 %v59_v13, %v30_v14 }
  0xa4   :  { %v66_v16 = vpop.eup %65 }
  0xa5   :  { %v31_v17 = vmul.f32 %v66_v16, %v13_v1  ;;  %41 = vst.msk [vmem:[#allocation2] sm:$0xff] %vm16_vm0, %v39_v15 }
  0xa7   :  { %v40_v18 = vmul.f32 %v59_v13, %v31_v17 }
  0xa9   :  { %42 = vst.msk [vmem:[#allocation2 + $0x8] sm:$0xff] %vm16_vm0, %v40_v18 }
  0xaa   :  { %78 = shalt.err (!%p75_p4)
}
  0xab   :  { %s90_s1 = smov 128   ;;  %s91_s17 = smov 8  }
  0xac   :  { %54 = dma.vmem_to_hbm [thread:$0]  %s49_s15, 256, %s125_s2, [#allocation3], %s90_s1, %s90_s1, %s91_s17  }
  0xad   :  { %87 = dma.done.wait [#allocation3], 256  }
  0xae   :  { %88 = vsyncadd [#allocation3], 4294967040 }
  0xaf   :  { %58 = vsyncpa [#allocation3], 1 }

// kernel: transformer_forward.10
= control target key start
LH: loop header
LB: loop body
LE: loop exit
PB: predicated region body
PF: predicated region fallthrough
CT: control target
= control target key end

     0   :  { %s819_s12 = smov 0   ;;  %s821_s13 = smov 0   ;;  %s899_s0 = inlined_call_operand.vmem [shape: bf16[4,2,8,8], index: 0, kind: input, shape index: {}]   ;;  %s900_s1 = inlined_call_operand.vmem [shape: bf16[4,8,8], index: 1, kind: input, shape index: {}]   ;;  %s901_s2 = inlined_call_operand.vmem [shape: bf16[4,8,8], index: 2, kind: input, shape index: {}]   ;;  %s902_s3 = inlined_call_operand.vmem [shape: bf16[4,2,8,8], index: 3, kind: output, shape index: {}]  }
   0x1   :  { %s823_s14 = smov 0  }
   0x2 LB: > { %s32_s15 = sadd.s32 1, %s789_s13  ;;  %p681_p0 = scmp.ge.s32.totalorder %s793_s14, 1  ;;  %s793_s14 = sphi %s823_s14, %s13_s14   ;;  %s789_s13 = sphi %s821_s13, %s904_s13   ;;  %s785_s12 = sphi %s819_s12, %s903_s12  }
   0x3   : > { %p34_p1 = scmp.ge.s32.totalorder %s32_s15, 4  ;;  %p191_p2 = scmp.lt.s32.totalorder %s793_s14, 5 }
   0x5   : > { %s906_s15 = smov (%p34_p1, %s32_s15), 0  ;;  %p192_p3 = pnand %p681_p0, %p191_p2 }
   0x6   : > { %p235_p4 = scmp.lt.s32.totalorder (!%p192_p3), %s785_s12, 3 }
   0x7   : > { %195 = sbr.rel (%p192_p3) target bundleno = 1278 (0x4fe), region = 32 }
   0xc   : > { %vm275_vm0 = vcmask 64512   ;;  %v795_v0 = vmov 0.0   ;;  %vm796_vm1 = vmmov 0   ;;  %s908_s12 = smov (!%p235_p4, %s785_s12), 3  ;;  %vm270_vm2 = vcmask 7168  }
   0xd   : > { %705 = vmatprep.subr.bf16.mxu0 %v795_v0  ;;  %276 = vst.msk [vmem:[#allocation4] sm:$0xff] %vm275_vm0, %v795_v0  ;;  %277 = vst.msk [vmem:[#allocation4 + $0x8] sm:$0xff] %vm275_vm0, %v795_v0  ;;  %707 = vmatprep.mubr.msk.bf16.mxu0 %vm796_vm1, %v795_v0  ;;  %s684_s16 = sshll.u32 %s908_s12, 2  ;;  %s695_s20 = sshll.u32 %s908_s12, 3  ;;  %v797_v4 = vmov -inf   ;;  %v798_v10 = vmov 0  }
   0xe   : > { %711 = vmatprep.subr.bf16.mxu1 %v795_v0  ;;  %713 = vmatprep.mubr.msk.bf16.mxu1 %vm796_vm1, %v795_v0  ;;  %s249_s19 = scalar_lea.vmem %s900_s1, %s684_s16  ;;  %s856_s23 = scalar_lea.vmem %s899_s0, %s695_s20  ;;  %271 = vst.msk [vmem:[#allocation2] sm:$0xff] %vm270_vm2, %v797_v4  ;;  %272 = vst.msk [vmem:[#allocation2 + $0x8] sm:$0xff] %vm270_vm2, %v797_v4  ;;  %vm363_vm3 = vcmask 1043456   ;;  %vm558_vm4 = vcmask 60416  }
   0xf   : > { %v278_v1 = vld [vmem:[%s249_s19] sm:$0xf]  ;;  %273 = vst.msk [vmem:[#allocation3] sm:$0xff] %vm270_vm2, %v795_v0  ;;  %274 = vst.msk [vmem:[#allocation3 + $0x8] sm:$0xff] %vm270_vm2, %v795_v0  ;;  %757 = vset.pattern.permute.xlu0 %v798_v10  ;;  %758 = vset.pattern.permute.xlu1 %v798_v10  ;;  %s256_s26 = scalar_lea.vmem %s901_s2, %s684_s16  ;;  %v690_v22 = vld [vmem:[%s856_s23 + $0x4] sm:$0xf]  ;;  %s264_s29 = scalar_lea.vmem %s902_s3, %s695_s20 }
  0x10   : > { %v286_v2 = vsel %vm275_vm0, %v278_v1, 0  ;;  %v280_v3 = vld [vmem:[%s856_s23] sm:$0xf] }
  0x11   : > { %706 = vmatpush3.bf16.xpose.msra.mxu0 %v286_v2  ;;  %v279_v15 = vld [vmem:[%s256_s26] sm:$0xf] }
  0x12   : > { %723 = vmatprep.subr.bf16.mxu0 %v795_v0  ;;  %v365_v16 = vsel %vm363_vm3, %v279_v15, 0 }
  0x13   : > { %712 = vmatpush3.bf16.msra.mxu1 %v365_v16 }
  0x14   : > { %717 = vmatprep.subr.bf16.mxu1 %v795_v0  ;;  %v352_v51 = vld [vmem:[#allocation4] sm:$0xff]  ;;  %v481_v4 = vld [vmem:[#allocation4 + $0x8] sm:$0xff] }
  0x15   : > { %v328_v11 = vld [vmem:[#allocation2] sm:$0xff]  ;;  %v456_v32 = vld [vmem:[#allocation2 + $0x8] sm:$0xff] }
  0x16   : > { %v344_v47 = vld [vmem:[#allocation3] sm:$0xff]  ;;  %v473_v57 = vld [vmem:[#allocation3 + $0x8] sm:$0xff] }
  0x18   : > { %708 = vmatmul.mubr.msk.bf16.vlgmr.msra.gmra.mxu0 %vm275_vm0, %v280_v3 }
  0x19   : > { %725 = vmatprep.mubr.msk.bf16.mxu0 %vm796_vm1, %v795_v0  ;;  %724 = vmatpush3.bf16.msra.mxu0 %v365_v16 }
  0xd8   : > { %v322_v5 = vpop.f32.mrf.mxu0 }
  0xd9   : > { %v329_v6 = vsel %vm275_vm0, %v322_v5, -inf }
  0xda   : > { %330 = vmax.xlane.f32.xlu0 %v329_v6  ;;  %v709_v7 = vpop.f32.mrf.mxu0 }
  0xdc   : > { %v325_v8 = vpop.f32.mrf.mxu0 }
  0xde   : > { %v710_v9 = vpop.f32.mrf.mxu0 }
 0x163   : > { %v331_v12 = vpop.xlane.xlu0 %330 }
 0x164   : > { %v332_v13 = vmax.f32 %v328_v11, %v331_v12 }
 0x166   : > { %v333_v14 = vsub.f32 %v328_v11, %v332_v13  ;;  %409 = vst.msk [vmem:[#allocation2] sm:$0xff] %vm270_vm2, %v332_v13  ;;  %338 = vperm.xlu0 %757, %v332_v13  }
 0x168   : > { %v334_v35 = vmul.f32 1.442695, %v333_v14 }
 0x1e1   : > { %v339_v17 = vpop.permute.xlu0 %338 }
 0x1e2   : > { %v341_v18 = vsub.f32 %v322_v5, %v339_v17 }
 0x1e4   : > { %v342_v19 = vmul.f32 1.442695, %v341_v18 }
 0x1e6   : > { %759 = vpow2.f32 %v342_v19 }
 0x1e7   : > { %761 = vpow2.f32 %v334_v35 }
 0x1f3   : > { %v760_v20 = vpop.eup %759 }
 0x1f4   : > { %v359_v21 = vpack.c.bf16 %v760_v20, %v760_v20  ;;  %v346_v37 = vsel %vm275_vm0, %v760_v20, 0.0  ;;  %v762_v39 = vpop.eup %761 }
 0x1f5   : > { %v345_v48 = vmul.f32 %v762_v39, %v344_v47 }
 0x1f6   : > { %714 = vmatmul.mubr.msk.bf16.vlgmr.msra.gmra.mxu1 %vm275_vm0, %v359_v21 }
 0x1f7   : > { %718 = vmatpush3.bf16.xpose.msra.mxu1 %v286_v2  ;;  %719 = vmatprep.mubr.msk.bf16.mxu1 %vm796_vm1, %v795_v0 }
 0x1fe   : > { %720 = vmatmul.mubr.msk.bf16.vlgmr.msra.gmra.mxu1 %vm275_vm0, %v690_v22 }
 0x2b6   : > { %v401_v23 = vpop.f32.mrf.mxu1 }
 0x2b8   : > { %v715_v24 = vpop.f32.mrf.mxu1 }
 0x2ba   : > { %v404_v25 = vpop.f32.mrf.mxu1 }
 0x2bc   : > { %v716_v26 = vpop.f32.mrf.mxu1 }
 0x2be   : > { %v449_v27 = vpop.f32.mrf.mxu1 }
 0x2bf   : > { %v457_v28 = vsel %vm275_vm0, %v449_v27, -inf }
 0x2c0   : > { %458 = vmax.xlane.f32.xlu1 %v457_v28  ;;  %v721_v29 = vpop.f32.mrf.mxu1 }
 0x2c2   : > { %v452_v30 = vpop.f32.mrf.mxu1 }
 0x2c4   : > { %v722_v31 = vpop.f32.mrf.mxu1 }
 0x349   : > { %v459_v33 = vpop.xlane.xlu1 %458 }
 0x34a   : > { %v460_v34 = vmax.f32 %v456_v32, %v459_v33 }
 0x34c   : > { %534 = vst.msk [vmem:[#allocation2 + $0x8] sm:$0xff] %vm270_vm2, %v460_v34  ;;  %466 = vperm.xlu1 %758, %v460_v34   ;;  %v461_v36 = vsub.f32 %v456_v32, %v460_v34 }
 0x34e   : > { %v462_v38 = vmul.f32 1.442695, %v461_v36 }
 0x350   : > { %763 = vpow2.f32 %v462_v38 }
 0x35d   : > { %v764_v40 = vpop.eup %763 }
 0x35e   : > { %v474_v58 = vmul.f32 %v764_v40, %v473_v57 }
 0x370   : > { %347 = vadd.xlane.f32.xlu1 %v346_v37 }
 0x381   : > { %355 = vperm.xlu1 %758, %v762_v39  }
 0x385   : > { %484 = vperm.xlu1 %758, %v764_v40  }
 0x3c7   : > { %v467_v41 = vpop.permute.xlu1 %466 }
 0x3c8   : > { %v469_v42 = vsub.f32 %v449_v27, %v467_v41 }
 0x3ca   : > { %v470_v43 = vmul.f32 1.442695, %v469_v42 }
 0x3cc   : > { %765 = vpow2.f32 %v470_v43 }
 0x3d9   : > { %v766_v44 = vpop.eup %765 }
 0x3da   : > { %v475_v45 = vsel %vm275_vm0, %v766_v44, 0.0  ;;  %v488_v46 = vpack.c.bf16 %v766_v44, %v766_v44 }
 0x3db   : > { %476 = vadd.xlane.f32.xlu0 %v475_v45 }
 0x3dc   : > { %726 = vmatmul.mubr.msk.bf16.vlgmr.msra.gmra.mxu0 %vm275_vm0, %v488_v46 }
 0x3f9   : > { %v348_v49 = vpop.xlane.xlu1 %347 }
 0x3fa   : > { %v349_v50 = vadd.f32 %v348_v49, %v345_v48 }
 0x3fc   : > { %351 = vst.msk [vmem:[#allocation3] sm:$0xff] %vm270_vm2, %v349_v50 }
 0x3fd   : > { %v356_v52 = vpop.permute.xlu1 %355 }
 0x3fe   : > { %v358_v53 = vmul.f32 %v356_v52, %v352_v51 }
 0x400   : > { %v407_v54 = vadd.f32 %v401_v23, %v358_v53 }
 0x401   : > { %v485_v63 = vpop.permute.xlu1 %484 }
 0x402   : > { %408 = vst.msk [vmem:[#allocation4] sm:$0xff] %vm275_vm0, %v407_v54  ;;  %v487_v5 = vmul.f32 %v485_v63, %v481_v4 }
 0x403   : > { %v540_v55 = vld [vmem:[#allocation3] sm:$0xff] }
 0x404   : > { %767 = vrcp.f32 %v540_v55 }
 0x409   : > { %v538_v0 = vld [vmem:[#allocation4] sm:$0xff] }
 0x411   : > { %v768_v56 = vpop.eup %767 }
 0x412   : > { %546 = vperm.xlu1 %758, %v768_v56  }
 0x464   : > { %v477_v59 = vpop.xlane.xlu0 %476 }
 0x465   : > { %v478_v60 = vadd.f32 %v477_v59, %v474_v58 }
 0x467   : > { %479 = vst.msk [vmem:[#allocation3 + $0x8] sm:$0xff] %vm270_vm2, %v478_v60 }
 0x46e   : > { %v541_v61 = vld [vmem:[#allocation3 + $0x8] sm:$0xff] }
 0x46f   : > { %769 = vrcp.f32 %v541_v61 }
 0x47c   : > { %v770_v62 = vpop.eup %769 }
 0x47d   : > { %551 = vperm.xlu0 %757, %v770_v62  }
 0x48d   : > { %v547_v1 = vpop.permute.xlu1 %546 }
 0x48e   : > { %v554_v2 = vmul.f32 %v547_v1, %v538_v0 }
 0x490   : > { %v556_v3 = vpack.c.bf16 %v554_v2, %v554_v2 }
 0x492   : > { %559 = vst.msk [vmem:[%s264_s29] sm:$0xf] %vm558_vm4, %v556_v3 }
 0x49c   : > { %v526_v6 = vpop.f32.mrf.mxu0 }
 0x49d   : > { %v532_v7 = vadd.f32 %v526_v6, %v487_v5 }
 0x49e   : > { %v727_v8 = vpop.f32.mrf.mxu0 }
 0x49f   : > { %533 = vst.msk [vmem:[#allocation4 + $0x8] sm:$0xff] %vm275_vm0, %v532_v7 }
 0x4a0   : > { %v529_v9 = vpop.f32.mrf.mxu0 }
 0x4a2   : > { %v728_v10 = vpop.f32.mrf.mxu0 }
 0x4a6   : > { %v539_v12 = vld [vmem:[#allocation4 + $0x8] sm:$0xff] }
 0x4f8   : > { %v552_v11 = vpop.permute.xlu0 %551 }
 0x4f9   : > { %v555_v13 = vmul.f32 %v552_v11, %v539_v12 }
 0x4fb   : > { %v557_v14 = vpack.c.bf16 %v555_v13, %v555_v13 }
 0x4fd   : > { %560 = vst.msk [vmem:[%s264_s29 + $0x4] sm:$0xf] %vm558_vm4, %v557_v14 }
 0x4fe PF: > { %s13_s14 = sadd.s32 1, %s793_s14   ;;  %s903_s12 = smov %s789_s13 }
 0x4ff   : > { %p10_p5 = scmp.ge.s32.totalorder %s13_s14, 6   ;;  %s904_s13 = smov %s906_s15 }
 0x501   :  { %12 = sbr.rel (!%p10_p5) target bundleno = 2 (0x2), region = 80 }

// kernel: transformer_forward.12
= control target key start
LH: loop header
LB: loop body
LE: loop exit
PB: predicated region body
PF: predicated region fallthrough
CT: control target
= control target key end

     0   :  { %vm29_vm0 = vcmask 261120   ;;  %v388_v7 = vmov 0.0   ;;  %vm389_vm1 = vmmov 0   ;;  %vm62_vm2 = vcmask 257024   ;;  %s484_s0 = inlined_call_operand.vmem [shape: f32[16,32], index: 0, kind: input, shape index: {}, may-alias: {0,5}]   ;;  %s485_s2 = inlined_call_operand.vmem [shape: bf16[32,64], index: 2, kind: input, shape index: {}]   ;;  %s486_s3 = inlined_call_operand.vmem [shape: bf16[32,64], index: 3, kind: input, shape index: {}]   ;;  %s487_s1 = inlined_call_operand.vmem [shape: f32[1,32], index: 1, kind: input, shape index: {}]   ;;  %s488_s4 = inlined_call_operand.vmem [shape: bf16[64,32], index: 4, kind: input, shape index: {}]   ;;  %s489_s5 = inlined_call_operand.vmem [shape: f32[16,32], index: 5, kind: output, shape index: {}, may-alias: {0,5}]  }
   0x1   :  { %v423_v0 = vld [vmem:[%s484_s0] sm:$0xff]  ;;  %v428_v1 = vld [vmem:[%s484_s0 + $0x8] sm:$0xff]  ;;  %337 = vmatprep.subr.bf16.mxu1 %v388_v7  ;;  %65 = vst.msk [vmem:[#allocation3] sm:$0xff] %vm29_vm0, %v388_v7  ;;  %66 = vst.msk [vmem:[#allocation3 + $0x8] sm:$0xff] %vm29_vm0, %v388_v7  ;;  %353 = vmatprep.subr.bf16.mxu0 %v388_v7  ;;  %vm243_vm3 = vcmask 523264  }
   0x2   :  { %v27_v2 = vmul.f32 %v423_v0, %v423_v0  ;;  %v28_v3 = vmul.f32 %v428_v1, %v428_v1  ;;  %v367_v6 = vld [vmem:[%s485_s2 + $0x8] sm:$0xff]   ;;  %v368_v8 = vld [vmem:[%s485_s2] sm:$0xff]   ;;  %341 = vmatprep.mubr.msk.bf16.mxu1 %vm389_vm1, %v388_v7  ;;  %361 = vmatprep.mubr.msk.bf16.mxu0 %vm389_vm1, %v388_v7  ;;  %v372_v27 = vld [vmem:[%s488_s4 + $0x18] sm:$0xff]  }
   0x3   :  { %338 = vmatpush3.bf16.msra.mxu1 %v367_v6  ;;  %v307_v16 = vld [vmem:[%s487_s1] ss:$0 sm:$0xff]  ;;  %v370_v24 = vld [vmem:[%s486_s3 + $0x8] sm:$0xff]   ;;  %354 = vmatpush3.bf16.msra.mxu0 %v372_v27  ;;  %v373_v28 = vld [vmem:[%s488_s4 + $0x10] sm:$0xff]  }
   0x4   :  { %v30_v4 = vsel %vm29_vm0, %v27_v2, 0.0  ;;  %v33_v5 = vsel %vm29_vm0, %v28_v3, 0.0  ;;  %339 = vmatprep.subr.bf16.mxu1 %v388_v7  ;;  %v371_v26 = vld [vmem:[%s486_s3] sm:$0xff]   ;;  %355 = vmatprep.subr.bf16.mxu0 %v388_v7  ;;  %v374_v29 = vld [vmem:[%s488_s4 + $0x8] sm:$0xff]  }
   0x5   :  { %31 = vadd.xlane.f32.xlu0 %v30_v4  ;;  %v375_v30 = vld [vmem:[%s488_s4] sm:$0xff]  }
   0x7   :  { %340 = vmatpush3.bf16.msra.mxu1 %v368_v8  ;;  %356 = vmatpush3.bf16.msra.mxu0 %v373_v28 }
   0x8   :  { %345 = vmatprep.subr.bf16.mxu1 %v388_v7  ;;  %357 = vmatprep.subr.bf16.mxu0 %v388_v7  ;;  %v208_v52 = vld [vmem:[#allocation3] sm:$0xff]  ;;  %v209_v56 = vld [vmem:[#allocation3 + $0x8] sm:$0xff] }
   0x9   :  { %34 = vadd.xlane.f32.xlu0 %v33_v5 }
   0xb   :  { %358 = vmatpush3.bf16.msra.mxu0 %v374_v29 }
   0xc   :  { %359 = vmatprep.subr.bf16.mxu0 %v388_v7 }
   0xf   :  { %360 = vmatpush3.bf16.msra.mxu0 %v375_v30 }
  0x8e   :  { %v32_v9 = vpop.xlane.xlu0 %31 }
  0x8f   :  { %v37_v10 = vmul.f32 0.03125, %v32_v9 }
  0x91   :  { %v39_v11 = vadd.f32 1e-06, %v37_v10 }
  0x92   :  { %v35_v12 = vpop.xlane.xlu0 %34 }
  0x93   :  { %376 = vrsqrt.f32 %v39_v11  ;;  %v38_v13 = vmul.f32 0.03125, %v35_v12 }
  0x95   :  { %v40_v14 = vadd.f32 1e-06, %v38_v13 }
  0x97   :  { %378 = vrsqrt.f32 %v40_v14 }
  0xa0   :  { %v377_v15 = vpop.eup %376 }
  0xa1   :  { %v43_v17 = vmul.f32 %v377_v15, %v423_v0 }
  0xa3   :  { %v52_v18 = vmul.f32 %v307_v16, %v43_v17 }
  0xa4   :  { %v379_v19 = vpop.eup %378 }
  0xa5   :  { %v324_v20 = vpack.c.bf16 %v52_v18, %v52_v18  ;;  %v44_v21 = vmul.f32 %v379_v19, %v428_v1 }
  0xa7   :  { %63 = vst.msk [vmem:[#allocation2] sm:$0xf] %vm62_vm2, %v324_v20  ;;  %v53_v22 = vmul.f32 %v307_v16, %v44_v21 }
  0xa9   :  { %v325_v23 = vpack.c.bf16 %v53_v22, %v53_v22 }
  0xab   :  { %64 = vst.msk [vmem:[#allocation2 + $0x4] sm:$0xf] %vm62_vm2, %v325_v23 }
  0xb2   :  { %v369_v25 = vld [vmem:[#allocation2] sm:$0xff]  }
  0xb3   :  { %342 = vmatmul.mubr.msk.bf16.vlgmr.msra.gmra.mxu1 %vm29_vm0, %v369_v25 }
  0xb4   :  { %346 = vmatpush3.bf16.msra.mxu1 %v370_v24  ;;  %349 = vmatprep.mubr.msk.bf16.mxu1 %vm389_vm1, %v388_v7 }
  0xb5   :  { %347 = vmatprep.subr.bf16.mxu1 %v388_v7 }
  0xb8   :  { %348 = vmatpush3.bf16.msra.mxu1 %v371_v26 }
  0xbb   :  { %350 = vmatmul.mubr.msk.bf16.vlgmr.msra.gmra.mxu1 %vm29_vm0, %v369_v25 }
 0x173   :  { %v128_v31 = vpop.f32.mrf.mxu1 }
 0x174   :  { %v317_v32 = vmul.f32 -1.442695, %v128_v31 }
 0x175   :  { %v343_v33 = vpop.f32.mrf.mxu1 }
 0x176   :  { %380 = vpow2.f32 %v317_v32 }
 0x177   :  { %v131_v34 = vpop.f32.mrf.mxu1 }
 0x178   :  { %v318_v35 = vmul.f32 -1.442695, %v131_v34 }
 0x179   :  { %v344_v36 = vpop.f32.mrf.mxu1 }
 0x17a   :  { %382 = vpow2.f32 %v318_v35 }
 0x17b   :  { %v185_v37 = vpop.f32.mrf.mxu1 }
 0x17d   :  { %v351_v38 = vpop.f32.mrf.mxu1 }
 0x17f   :  { %v188_v39 = vpop.f32.mrf.mxu1 }
 0x181   :  { %v352_v40 = vpop.f32.mrf.mxu1 }
 0x183   :  { %v381_v41 = vpop.eup %380 }
 0x184   :  { %v198_v42 = vadd.f32 1.0, %v381_v41 }
 0x186   :  { %384 = vrcp.f32 %v198_v42 }
 0x187   :  { %v383_v43 = vpop.eup %382 }
 0x188   :  { %v199_v44 = vadd.f32 1.0, %v383_v43 }
 0x18a   :  { %386 = vrcp.f32 %v199_v44 }
 0x193   :  { %v385_v45 = vpop.eup %384 }
 0x194   :  { %v204_v46 = vmul.f32 %v385_v45, %v128_v31 }
 0x196   :  { %v206_v49 = vmul.f32 %v204_v46, %v185_v37 }
 0x197   :  { %v387_v47 = vpop.eup %386 }
 0x198   :  { %v205_v48 = vmul.f32 %v387_v47, %v131_v34 }
 0x19a   :  { %v207_v50 = vmul.f32 %v205_v48, %v188_v39 }
 0x19c   :  { %v210_v51 = vpack.c.bf16 %v207_v50, %v206_v49 }
 0x19e   :  { %362 = vmatmul.mubr.msk.bf16.vlgmr.msra.gmra.mxu0 %vm243_vm3, %v210_v51 }
 0x25e   :  { %v281_v53 = vpop.f32.mrf.mxu0 }
 0x25f   :  { %v288_v54 = vadd.f32 %v281_v53, %v208_v52 }
 0x260   :  { %v363_v55 = vpop.f32.mrf.mxu0 }
 0x261   :  { %290 = vst.msk [vmem:[#allocation3] sm:$0xff] %vm29_vm0, %v288_v54 }
 0x262   :  { %v284_v57 = vpop.f32.mrf.mxu0 }
 0x263   :  { %v289_v58 = vadd.f32 %v284_v57, %v209_v56 }
 0x264   :  { %v364_v59 = vpop.f32.mrf.mxu0 }
 0x265   :  { %291 = vst.msk [vmem:[#allocation3 + $0x8] sm:$0xff] %vm29_vm0, %v289_v58 }
 0x268   :  { %v297_v60 = vld [vmem:[#allocation3] sm:$0xff] }
 0x269   :  { %v299_v61 = vadd.f32 %v297_v60, %v423_v0 }
 0x26b   :  { %301 = vst.msk [vmem:[%s489_s5] sm:$0xff] %vm29_vm0, %v299_v61 }
 0x26c   :  { %v298_v62 = vld [vmem:[#allocation3 + $0x8] sm:$0xff] }
 0x26d   :  { %v300_v63 = vadd.f32 %v298_v62, %v428_v1 }
 0x26f   :  { %302 = vst.msk [vmem:[%s489_s5 + $0x8] sm:$0xff] %vm29_vm0, %v300_v63 }

</bundles_post_ra>
